<compile_context>
chip_gen: v7x
topology: tpu7x:2x2x1
jax: 0.10.0
libtpu: 0.0.40
codegen_flags: <defaults>
</compile_context>

<pallas_src>
import jax
import jax.numpy as jnp
from jax.experimental import pallas as pl
from jax.experimental.pallas import tpu as pltpu

# ------------------------- model configuration (synthetic) -------------------------
NUM_MODELS = 4
BATCH = 8
INPUT_LEN = 256          # e.g. 16x16 "MNIST" flattened
HIDDEN = 64
OUTPUT_LEN = 10
OUTPUT_PAD = 128         # lane-dense per-model output width; real logits in [:, :OUTPUT_LEN]

INPUT_BITS, INPUT_MAX = 2, 1.0
HIDDEN_BITS, HIDDEN_MAX = 2, 1.0
OUTPUT_BITS, OUTPUT_MAX = 2, 1.33
INPUT_FANIN, HIDDEN_FANIN, OUTPUT_FANIN = 6, 6, 6

# Brevitas-style INT QuantHardTanh constants (narrow_range=False, all layers 2-bit).
SC_IN = INPUT_MAX / (2.0 ** (INPUT_BITS - 1))       # 0.5
SC_H = HIDDEN_MAX / (2.0 ** (HIDDEN_BITS - 1))      # 0.5
SC_OUT = OUTPUT_MAX / (2.0 ** (OUTPUT_BITS - 1))    # 0.665
QMIN = -(2.0 ** (INPUT_BITS - 1))                   # -2
QMAX = 2.0 ** (INPUT_BITS - 1) - 1.0                # +1


def _pick_model_groups():
    """1 grid step on single-TC chips (v5e/v6e); 2 'parallel' steps on 2-TC v7x."""
    try:
        kind = jax.devices()[0].device_kind.lower()
    except Exception:
        return 1
    if ("v7" in kind or "7x" in kind) and NUM_MODELS % 2 == 0:
        return 2
    return 1


# ----------------------------------- Pallas kernel ---------------------------------
def make_ensemble_kernel(mpg):
    """Kernel for one model group of `mpg` models packed block-diagonally along lanes."""
    d_in = mpg * INPUT_LEN
    d_h = mpg * HIDDEN
    d_out = mpg * OUTPUT_PAD
    # offsets into the per-group affine slab [in_scale | in_shift | t1 | t2 | t3]
    o_shift = d_in
    o_t1 = 2 * d_in
    o_t2 = o_t1 + d_h
    o_t3 = o_t2 + d_h
    out_factor = SC_OUT / NUM_MODELS   # output quant scale * ensemble mean, applied once

    def kernel(x_ref, aff_ref, w1_ref, w2_ref, w3_ref, out_ref):
        # x_ref  : (B, IN)              f32, shared input
        # aff_ref: (1, 1, AFF_W)        f32, folded affine slab for this group
        # w1_ref : (1, d_in, d_h)       bf16, block-diag, scales folded into columns
        # w2_ref : (1, d_h,  d_h)       bf16
        # w3_ref : (1, d_h,  d_out)     bf16 (per-model 128-wide, lane-padded output blocks)
        # out_ref: (1, B, OUTPUT_PAD)   f32, this group's contribution to the ensemble mean
        x = x_ref[...]                                             # (B, IN)
        xg = jnp.concatenate([x] * mpg, axis=1) if mpg > 1 else x  # (B, d_in)

        in_scale = aff_ref[0, :, 0:d_in]                           # (1, d_in)
        in_shift = aff_ref[0, :, o_shift:o_shift + d_in]
        t1 = aff_ref[0, :, o_t1:o_t1 + d_h]
        t2 = aff_ref[0, :, o_t2:o_t2 + d_h]
        t3 = aff_ref[0, :, o_t3:o_t3 + d_out]

        # input quant (integer quant domain; inv_scale folded into in_scale/in_shift)
        p = jnp.clip(jnp.round(xg * in_scale + in_shift), QMIN, QMAX)

        # layer 1: one block-diagonal, lane-dense matmul for the whole group
        z = jnp.dot(p.astype(jnp.bfloat16), w1_ref[0], preferred_element_type=jnp.float32)
        p = jnp.clip(jnp.round(z + t1), QMIN, QMAX)

        # layer 2
        z = jnp.dot(p.astype(jnp.bfloat16), w2_ref[0], preferred_element_type=jnp.float32)
        p = jnp.clip(jnp.round(z + t2), QMIN, QMAX)

        # layer 3 (output)
        z = jnp.dot(p.astype(jnp.bfloat16), w3_ref[0], preferred_element_type=jnp.float32)
        p = jnp.clip(jnp.round(z + t3), QMIN, QMAX)                # (B, d_out), integer levels

        # sum the per-model 128-wide blocks, then apply output scale * 1/NUM_MODELS
        acc = p[:, 0:OUTPUT_PAD]
        for m in range(1, mpg):
            acc = acc + p[:, m * OUTPUT_PAD:(m + 1) * OUTPUT_PAD]
        out_ref[0] = acc * out_factor

    return kernel


def averaging_mnist_neq_forward(x, kparams):
    aff, w1, w2, w3 = kparams
    mg = w1.shape[0]                     # model groups (grid size)
    mpg = w1.shape[1] // INPUT_LEN       # models per group
    B = x.shape[0]

    kernel = make_ensemble_kernel(mpg)
    part = pl.pallas_call(
        kernel,
        out_shape=jax.ShapeDtypeStruct((mg, B, OUTPUT_PAD), jnp.float32),
        grid=(mg,),
        in_specs=[
            pl.BlockSpec((B, INPUT_LEN), lambda i: (0, 0)),            # x shared
            pl.BlockSpec((1,) + aff.shape[1:], lambda i: (i, 0, 0)),   # affine slab
            pl.BlockSpec((1,) + w1.shape[1:], lambda i: (i, 0, 0)),
            pl.BlockSpec((1,) + w2.shape[1:], lambda i: (i, 0, 0)),
            pl.BlockSpec((1,) + w3.shape[1:], lambda i: (i, 0, 0)),
        ],
        out_specs=pl.BlockSpec((1, B, OUTPUT_PAD), lambda i: (i, 0, 0)),
        compiler_params=pltpu.CompilerParams(
            dimension_semantics=("parallel",)),     # independent groups -> megacore on v7x
    )(x, aff, w1, w2, w3)

    out = part[0] if mg == 1 else part.sum(axis=0)
    return out[:, :OUTPUT_LEN]


# ------------------------------ parameter construction ------------------------------
def _fixed_fanin_mask(key, out_dim, in_dim, fan_in):
    """RandomFixedSparsityMask2D equivalent: each output connects to `fan_in` random inputs."""
    r = jax.random.uniform(key, (out_dim, in_dim))
    idx = jnp.argsort(r, axis=1)[:, :fan_in]
    mask = jnp.zeros((out_dim, in_dim), jnp.float32)
    mask = mask.at[jnp.arange(out_dim)[:, None], idx].set(1.0)
    return mask


def _folded_bn(key, dim):
    """Eval-mode BatchNorm1d folded to per-feature (scale, shift)."""
    k1, k2, k3, k4 = jax.random.split(key, 4)
    gamma = 1.0 + 0.1 * jax.random.normal(k1, (dim,), jnp.float32)
    beta = 0.1 * jax.random.normal(k2, (dim,), jnp.float32)
    mean = 0.1 * jax.random.normal(k3, (dim,), jnp.float32)
    var = 1.0 + 0.1 * jax.random.uniform(k4, (dim,), jnp.float32)
    s = gamma / jnp.sqrt(var + 1e-5)
    t = beta - mean * s
    return s, t


def make_raw_params(key):
    """Per-model params in torch-like layout (weights are (out, in), f32)."""
    models = []
    for m in range(NUM_MODELS):
        km = jax.random.fold_in(key, m)
        ks = jax.random.split(km, 10)

        # input quant pre-transforms: BatchNorm1d(IN) + ScalarBias(-0.25)
        s_in, t_in = _folded_bn(ks[0], INPUT_LEN)
        t_in = t_in - 0.25

        def sparse_layer(kw, kb, kbn, kmask, out_d, in_d, fan_in):
            w = (jax.random.normal(kw, (out_d, in_d), jnp.float32)
                 / jnp.sqrt(jnp.float32(in_d)))
            w = w * _fixed_fanin_mask(kmask, out_d, in_d, fan_in)
            b = 0.05 * jax.random.normal(kb, (out_d,), jnp.float32)
            s, t = _folded_bn(kbn, out_d)
            # fold linear bias into BN shift:  bn(Wx + b) = (Wx)*s + (b*s + t)
            return w, s, t + b * s

        w1, s1, t1 = sparse_layer(ks[1], ks[2], ks[3], jax.random.fold_in(km, 101),
                                  HIDDEN, INPUT_LEN, INPUT_FANIN)
        w2, s2, t2 = sparse_layer(ks[4], ks[5], ks[6], jax.random.fold_in(km, 102),
                                  HIDDEN, HIDDEN, HIDDEN_FANIN)
        w3, s3, t3 = sparse_layer(ks[7], ks[8], ks[9], jax.random.fold_in(km, 103),
                                  OUTPUT_LEN, HIDDEN, OUTPUT_FANIN)
        models.append((s_in, t_in, w1, s1, t1, w2, s2, t2, w3, s3, t3))
    return models


def fold_model(p):
    """Fold BN scales + quant (inv)scales into pre-transposed (in, out) bf16 weights.

    Activations then live in the integer quant domain; only per-layer shifts remain.
    """
    s_in, t_in, w1, s1, t1, w2, s2, t2, w3, s3, t3 = p
    in_scale = s_in / SC_IN
    in_shift = t_in / SC_IN
    w1f = (w1.T * (SC_IN * s1 / SC_H)[None, :]).astype(jnp.bfloat16)
    t1f = t1 / SC_H
    w2f = (w2.T * (SC_H * s2 / SC_H)[None, :]).astype(jnp.bfloat16)
    t2f = t2 / SC_H
    w3f = (w3.T * (SC_H * s3 / SC_OUT)[None, :]).astype(jnp.bfloat16)
    t3f = t3 / SC_OUT
    return in_scale, in_shift, w1f, t1f, w2f, t2f, w3f, t3f


def _block_diag(blocks):
    r = sum(b.shape[0] for b in blocks)
    c = sum(b.shape[1] for b in blocks)
    out = jnp.zeros((r, c), blocks[0].dtype)
    ro = co = 0
    for b in blocks:
        out = out.at[ro:ro + b.shape[0], co:co + b.shape[1]].set(b)
        ro += b.shape[0]
        co += b.shape[1]
    return out


def pack_params_for_kernel(folded, model_groups):
    """Block-diagonal lane packing per model group + one affine slab per group."""
    m = len(folded)
    assert m % model_groups == 0
    mpg = m // model_groups
    pad = OUTPUT_PAD - OUTPUT_LEN
    affs, w1s, w2s, w3s = [], [], [], []
    for g in range(model_groups):
        grp = folded[g * mpg:(g + 1) * mpg]
        in_scale = jnp.concatenate([f[0] for f in grp])
        in_shift = jnp.concatenate([f[1] for f in grp])
        t1 = jnp.concatenate([f[3] for f in grp])
        t2 = jnp.concatenate([f[5] for f in grp])
        t3 = jnp.concatenate([jnp.pad(f[7], (0, pad)) for f in grp])      # pad shifts = 0
        affs.append(jnp.concatenate([in_scale, in_shift, t1, t2, t3])[None, :])
        w1s.append(_block_diag([f[2] for f in grp]))
        w2s.append(_block_diag([f[4] for f in grp]))
        w3s.append(_block_diag([jnp.pad(f[6], ((0, 0), (0, pad))) for f in grp]))
    return (jnp.stack(affs).astype(jnp.float32),   # (MG, 1, AFF_W)
            jnp.stack(w1s), jnp.stack(w2s), jnp.stack(w3s))


# ------------------------------ pure-JAX references ---------------------------------
def reference_forward_folded(x, folded):
    """Same folded math / same bf16 weights as the kernel, per model (dense matmuls)."""
    outs = []
    for (in_scale, in_shift, w1f, t1f, w2f, t2f, w3f, t3f) in folded:
        p = jnp.clip(jnp.round(x * in_scale + in_shift), QMIN, QMAX)
        z = jnp.dot(p.astype(jnp.bfloat16), w1f, preferred_element_type=jnp.float32)
        p = jnp.clip(jnp.round(z + t1f), QMIN, QMAX)
        z = jnp.dot(p.astype(jnp.bfloat16), w2f, preferred_element_type=jnp.float32)
        p = jnp.clip(jnp.round(z + t2f), QMIN, QMAX)
        z = jnp.dot(p.astype(jnp.bfloat16), w3f, preferred_element_type=jnp.float32)
        p = jnp.clip(jnp.round(z + t3f), QMIN, QMAX)
        outs.append(p)
    return sum(outs) * (SC_OUT / NUM_MODELS)


def reference_forward_original(x, raw):
    """Original torch-like semantics (unfolded, f32 weights): stack(...).mean(0)."""
    def qht(v, max_val, bits):
        sc = max_val / (2.0 ** (bits - 1))
        return jnp.clip(jnp.round(v / sc), -(2.0 ** (bits - 1)), 2.0 ** (bits - 1) - 1) * sc
    outs = []
    for (s_in, t_in, w1, s1, t1, w2, s2, t2, w3, s3, t3) in raw:
        h = qht(x * s_in + t_in, INPUT_MAX, INPUT_BITS)
        h = qht((h @ w1.T) * s1 + t1, HIDDEN_MAX, HIDDEN_BITS)
        h = qht((h @ w2.T) * s2 + t2, HIDDEN_MAX, HIDDEN_BITS)
        outs.append(qht((h @ w3.T) * s3 + t3, OUTPUT_MAX, OUTPUT_BITS))
    return jnp.stack(outs, axis=0).mean(axis=0)


# TODO(synk): the verilog_forward / PyVerilator simulation path (hardware-in-the-loop
#             bit-string I/O) and the shared_input_layer / shared_output_layer config
#             branches have no Pallas equivalent; only the pytorch_forward averaging
#             path (non-shared) is implemented.

if __name__ == "__main__":
    key = jax.random.PRNGKey(0)
    kx, kp = jax.random.split(key)
    x = jax.random.normal(kx, (BATCH, INPUT_LEN), jnp.float32)

    raw_params = make_raw_params(kp)
    folded_params = [fold_model(p) for p in raw_params]
    model_groups = _pick_model_groups()
    kparams = pack_params_for_kernel(folded_params, model_groups)

    out = jax.jit(averaging_mnist_neq_forward)(x, kparams)
    out = jax.block_until_ready(out)
    assert out.shape == (BATCH, OUTPUT_LEN)

    # Tight check vs a pure-JAX reference using the exact same folded bf16 params/math.
    ref = reference_forward_folded(x, folded_params)
    assert jnp.allclose(out, ref, atol=1e-4, rtol=0.0), "kernel != folded reference"

    # Coarse sanity vs the original (unfolded, f32-weight) torch semantics: bf16 weight
    # rounding can flip individual quantization buckets, so only bound the deviation.
    ref0 = reference_forward_original(x, raw_params)
    d = jnp.abs(out - ref0)
    assert float(jnp.max(d)) < 1.0 and float(jnp.mean(d)) < 0.2, "semantic drift too large"

    print("KERNEL_OK")
</pallas_src>

<mosaic_0001>
module attributes {stable_mosaic.version = 11 : i64} {
  func.func @kernel(%arg0: i32, %arg1: memref<8x256xf32, #tpu.memory_space<vmem>>, %arg2: memref<1x1x3072xf32, #tpu.memory_space<vmem>>, %arg3: memref<1x1024x256xbf16, #tpu.memory_space<vmem>>, %arg4: memref<1x256x256xbf16, #tpu.memory_space<vmem>>, %arg5: memref<1x256x512xbf16, #tpu.memory_space<vmem>>, %arg6: memref<1x8x128xf32, #tpu.memory_space<vmem>>) attributes {dimension_semantics = [#tpu.dimension_semantics<parallel>], iteration_bounds = array<i64: 1>, scalar_prefetch = 0 : i64, scratch_operands = 0 : i64, tpu.core_type = #tpu.core_type<tc>, window_params = [{pipeline_mode = #tpu.pipeline_mode<synchronous>, transform_indices = @transform_0, window_bounds = array<i64: 8, 256>}, {transform_indices = @transform_1, window_bounds = array<i64: 1, 1, 3072>}, {transform_indices = @transform_2, window_bounds = array<i64: 1, 1024, 256>}, {transform_indices = @transform_3, window_bounds = array<i64: 1, 256, 256>}, {transform_indices = @transform_4, window_bounds = array<i64: 1, 256, 512>}, {transform_indices = @transform_5, window_bounds = array<i64: 1, 8, 128>}]} {
    %c0 = arith.constant 0 : index
    %c0_0 = arith.constant 0 : index
    %0 = vector.load %arg1[%c0, %c0_0] : memref<8x256xf32, #tpu.memory_space<vmem>>, vector<8x256xf32>
    %1 = tpu.concatenate %0, %0, %0, %0 in 1 : vector<8x256xf32>, vector<8x256xf32>, vector<8x256xf32>, vector<8x256xf32> -> vector<8x1024xf32>
    %c0_1 = arith.constant 0 : index
    %c0_2 = arith.constant 0 : index
    %c0_3 = arith.constant 0 : index
    %2 = vector.load %arg2[%c0_1, %c0_2, %c0_3] : memref<1x1x3072xf32, #tpu.memory_space<vmem>>, vector<1x1x1024xf32>
    %3 = vector.shape_cast %2 : vector<1x1x1024xf32> to vector<1x1024xf32>
    %c0_4 = arith.constant 0 : index
    %c0_5 = arith.constant 0 : index
    %c1024 = arith.constant 1024 : index
    %4 = vector.load %arg2[%c0_4, %c0_5, %c1024] : memref<1x1x3072xf32, #tpu.memory_space<vmem>>, vector<1x1x1024xf32>
    %5 = vector.shape_cast %4 : vector<1x1x1024xf32> to vector<1x1024xf32>
    %c0_6 = arith.constant 0 : index
    %c0_7 = arith.constant 0 : index
    %c2048 = arith.constant 2048 : index
    %6 = vector.load %arg2[%c0_6, %c0_7, %c2048] : memref<1x1x3072xf32, #tpu.memory_space<vmem>>, vector<1x1x256xf32>
    %7 = vector.shape_cast %6 : vector<1x1x256xf32> to vector<1x256xf32>
    %c0_8 = arith.constant 0 : index
    %c0_9 = arith.constant 0 : index
    %c2304 = arith.constant 2304 : index
    %8 = vector.load %arg2[%c0_8, %c0_9, %c2304] : memref<1x1x3072xf32, #tpu.memory_space<vmem>>, vector<1x1x256xf32>
    %9 = vector.shape_cast %8 : vector<1x1x256xf32> to vector<1x256xf32>
    %c0_10 = arith.constant 0 : index
    %c0_11 = arith.constant 0 : index
    %c2560 = arith.constant 2560 : index
    %10 = vector.load %arg2[%c0_10, %c0_11, %c2560] : memref<1x1x3072xf32, #tpu.memory_space<vmem>>, vector<1x1x512xf32>
    %11 = vector.shape_cast %10 : vector<1x1x512xf32> to vector<1x512xf32>
    %12 = vector.broadcast %3 : vector<1x1024xf32> to vector<8x1024xf32>
    %13 = arith.mulf %1, %12 : vector<8x1024xf32>
    %14 = vector.broadcast %5 : vector<1x1024xf32> to vector<8x1024xf32>
    %15 = arith.addf %13, %14 : vector<8x1024xf32>
    %16 = math.roundeven %15 : vector<8x1024xf32>
    %cst = arith.constant -2.000000e+00 : f32
    %cst_12 = arith.constant 1.000000e+00 : f32
    %17 = vector.broadcast %cst : f32 to vector<8x1024xf32>
    %18 = arith.maximumf %17, %16 : vector<8x1024xf32>
    %19 = vector.broadcast %cst_12 : f32 to vector<8x1024xf32>
    %20 = arith.minimumf %19, %18 : vector<8x1024xf32>
    %21 = arith.truncf %20 : vector<8x1024xf32> to vector<8x1024xbf16>
    %c0_13 = arith.constant 0 : index
    %c0_14 = arith.constant 0 : index
    %c0_15 = arith.constant 0 : index
    %22 = vector.load %arg3[%c0_13, %c0_14, %c0_15] : memref<1x1024x256xbf16, #tpu.memory_space<vmem>>, vector<1x1024x256xbf16>
    %23 = vector.shape_cast %22 : vector<1x1024x256xbf16> to vector<1024x256xbf16>
    %cst_16 = arith.constant dense<0.000000e+00> : vector<8x256xf32>
    %24 = tpu.matmul %21, %23, %cst_16 {dimension_numbers = #tpu.dot_dimension_numbers<[1], [0], [0], [1], [0, 0, 1, 1], [], []>} : vector<8x1024xbf16>, vector<1024x256xbf16>, vector<8x256xf32> -> vector<8x256xf32>
    %25 = vector.broadcast %7 : vector<1x256xf32> to vector<8x256xf32>
    %26 = arith.addf %24, %25 : vector<8x256xf32>
    %27 = math.roundeven %26 : vector<8x256xf32>
    %cst_17 = arith.constant -2.000000e+00 : f32
    %cst_18 = arith.constant 1.000000e+00 : f32
    %28 = vector.broadcast %cst_17 : f32 to vector<8x256xf32>
    %29 = arith.maximumf %28, %27 : vector<8x256xf32>
    %30 = vector.broadcast %cst_18 : f32 to vector<8x256xf32>
    %31 = arith.minimumf %30, %29 : vector<8x256xf32>
    %32 = arith.truncf %31 : vector<8x256xf32> to vector<8x256xbf16>
    %c0_19 = arith.constant 0 : index
    %c0_20 = arith.constant 0 : index
    %c0_21 = arith.constant 0 : index
    %33 = vector.load %arg4[%c0_19, %c0_20, %c0_21] : memref<1x256x256xbf16, #tpu.memory_space<vmem>>, vector<1x256x256xbf16>
    %34 = vector.shape_cast %33 : vector<1x256x256xbf16> to vector<256x256xbf16>
    %cst_22 = arith.constant dense<0.000000e+00> : vector<8x256xf32>
    %35 = tpu.matmul %32, %34, %cst_22 {dimension_numbers = #tpu.dot_dimension_numbers<[1], [0], [0], [1], [0, 0, 1, 1], [], []>} : vector<8x256xbf16>, vector<256x256xbf16>, vector<8x256xf32> -> vector<8x256xf32>
    %36 = vector.broadcast %9 : vector<1x256xf32> to vector<8x256xf32>
    %37 = arith.addf %35, %36 : vector<8x256xf32>
    %38 = math.roundeven %37 : vector<8x256xf32>
    %cst_23 = arith.constant -2.000000e+00 : f32
    %cst_24 = arith.constant 1.000000e+00 : f32
    %39 = vector.broadcast %cst_23 : f32 to vector<8x256xf32>
    %40 = arith.maximumf %39, %38 : vector<8x256xf32>
    %41 = vector.broadcast %cst_24 : f32 to vector<8x256xf32>
    %42 = arith.minimumf %41, %40 : vector<8x256xf32>
    %43 = arith.truncf %42 : vector<8x256xf32> to vector<8x256xbf16>
    %c0_25 = arith.constant 0 : index
    %c0_26 = arith.constant 0 : index
    %c0_27 = arith.constant 0 : index
    %44 = vector.load %arg5[%c0_25, %c0_26, %c0_27] : memref<1x256x512xbf16, #tpu.memory_space<vmem>>, vector<1x256x512xbf16>
    %45 = vector.shape_cast %44 : vector<1x256x512xbf16> to vector<256x512xbf16>
    %cst_28 = arith.constant dense<0.000000e+00> : vector<8x512xf32>
    %46 = tpu.matmul %43, %45, %cst_28 {dimension_numbers = #tpu.dot_dimension_numbers<[1], [0], [0], [1], [0, 0, 1, 1], [], []>} : vector<8x256xbf16>, vector<256x512xbf16>, vector<8x512xf32> -> vector<8x512xf32>
    %47 = vector.broadcast %11 : vector<1x512xf32> to vector<8x512xf32>
    %48 = arith.addf %46, %47 : vector<8x512xf32>
    %49 = math.roundeven %48 : vector<8x512xf32>
    %cst_29 = arith.constant -2.000000e+00 : f32
    %cst_30 = arith.constant 1.000000e+00 : f32
    %50 = vector.broadcast %cst_29 : f32 to vector<8x512xf32>
    %51 = arith.maximumf %50, %49 : vector<8x512xf32>
    %52 = vector.broadcast %cst_30 : f32 to vector<8x512xf32>
    %53 = arith.minimumf %52, %51 : vector<8x512xf32>
    %54 = vector.extract_strided_slice %53 {offsets = [0, 0], sizes = [8, 128], strides = [1, 1]} : vector<8x512xf32> to vector<8x128xf32>
    %55 = vector.extract_strided_slice %53 {offsets = [0, 128], sizes = [8, 128], strides = [1, 1]} : vector<8x512xf32> to vector<8x128xf32>
    %56 = arith.addf %54, %55 : vector<8x128xf32>
    %57 = vector.extract_strided_slice %53 {offsets = [0, 256], sizes = [8, 128], strides = [1, 1]} : vector<8x512xf32> to vector<8x128xf32>
    %58 = arith.addf %56, %57 : vector<8x128xf32>
    %59 = vector.extract_strided_slice %53 {offsets = [0, 384], sizes = [8, 128], strides = [1, 1]} : vector<8x512xf32> to vector<8x128xf32>
    %60 = arith.addf %58, %59 : vector<8x128xf32>
    %cst_31 = arith.constant 1.662500e-01 : f32
    %61 = vector.broadcast %cst_31 : f32 to vector<8x128xf32>
    %62 = arith.mulf %60, %61 : vector<8x128xf32>
    %c0_32 = arith.constant 0 : index
    %c0_33 = arith.constant 0 : index
    %c0_34 = arith.constant 0 : index
    %63 = vector.load %arg6[%c0_32, %c0_33, %c0_34] : memref<1x8x128xf32, #tpu.memory_space<vmem>>, vector<1x8x128xf32>
    %64 = vector.shape_cast %63 : vector<1x8x128xf32> to vector<8x128xf32>
    %65 = vector.shape_cast %62 : vector<8x128xf32> to vector<1x8x128xf32>
    tpu.vector_store %arg6[%c0_32, %c0_33, %c0_34], %65 {strides = array<i32>} : memref<1x8x128xf32, #tpu.memory_space<vmem>>, vector<1x8x128xf32>,
    return
  }
  func.func @transform_0(%arg0: i32) -> (i32, i32) {
    %c0_i32 = arith.constant 0 : i32
    %c0_i32_0 = arith.constant 0 : i32
    %c0_i32_1 = arith.constant 0 : i32
    return %c0_i32, %c0_i32_0 : i32, i32
  }
  func.func @transform_1(%arg0: i32) -> (i32, i32, i32) {
    %c0_i32 = arith.constant 0 : i32
    %c0_i32_0 = arith.constant 0 : i32
    %c0_i32_1 = arith.constant 0 : i32
    return %arg0, %c0_i32, %c0_i32_0 : i32, i32, i32
  }
  func.func @transform_2(%arg0: i32) -> (i32, i32, i32) {
    %c0_i32 = arith.constant 0 : i32
    %c0_i32_0 = arith.constant 0 : i32
    %c0_i32_1 = arith.constant 0 : i32
    return %arg0, %c0_i32, %c0_i32_0 : i32, i32, i32
  }
  func.func @transform_3(%arg0: i32) -> (i32, i32, i32) {
    %c0_i32 = arith.constant 0 : i32
    %c0_i32_0 = arith.constant 0 : i32
    %c0_i32_1 = arith.constant 0 : i32
    return %arg0, %c0_i32, %c0_i32_0 : i32, i32, i32
  }
  func.func @transform_4(%arg0: i32) -> (i32, i32, i32) {
    %c0_i32 = arith.constant 0 : i32
    %c0_i32_0 = arith.constant 0 : i32
    %c0_i32_1 = arith.constant 0 : i32
    return %arg0, %c0_i32, %c0_i32_0 : i32, i32, i32
  }
  func.func @transform_5(%arg0: i32) -> (i32, i32, i32) {
    %c0_i32 = arith.constant 0 : i32
    %c0_i32_0 = arith.constant 0 : i32
    %c0_i32_1 = arith.constant 0 : i32
    return %arg0, %c0_i32, %c0_i32_0 : i32, i32, i32
  }
}

</mosaic_0001>

<bundles_post_ra>
// kernel: averaging_mnist_neq_forward.1
= control target key start
LH: loop header
LB: loop body
LE: loop exit
PB: predicated region body
PF: predicated region fallthrough
CT: control target
= control target key end

     0   :  { %10 = vsyncpa [#allocation3], 0  ;;  %s2874_s0 = inlined_call_operand.hbm [shape: f32[8,256], index: 0, kind: input, shape index: {}]   ;;  %s2875_s1 = inlined_call_operand.hbm [shape: f32[1,1,3072], index: 1, kind: input, shape index: {}]   ;;  %s2876_s2 = inlined_call_operand.hbm [shape: bf16[1,1024,256], index: 2, kind: input, shape index: {}]   ;;  %s2877_s3 = inlined_call_operand.hbm [shape: bf16[1,256,256], index: 3, kind: input, shape index: {}]   ;;  %s2878_s4 = inlined_call_operand.hbm [shape: bf16[1,256,512], index: 4, kind: input, shape index: {}]   ;;  %s2879_s5 = inlined_call_operand.hbm [shape: f32[1,8,128], index: 5, kind: output, shape index: {}]  }
   0x1   :  { %11 = vsyncpa [#allocation6], 0 }
   0x2   :  { %12 = vsyncpa [#allocation9], 0 }
   0x3   :  { %13 = vsyncpa [#allocation4], 0  ;;  %s2688_s18 = smov [#allocation5]   ;;  %s2548_s22 = scalar_lea.hbm %s2875_s1, 384 }
   0x4   :  { %s30_s19 = sshll.u32 %s2688_s18, 4  ;;  %p2549_p0 = scmp.ne.s32.totalorder %s2875_s1, %s2548_s22  ;;  %s31_s19 = int_to_ptr.vmem [resolvable:$true] %s30_s19 }
   0x5   :  { %p2552_p1 = scmp.lt.u32.totalorder %s2548_s22, %s2875_s1 }
   0x7   :  { %p2554_p2 = pnand %p2552_p1, %p2549_p0 }
   0x9   :  { %2557 = shalt.err (!%p2554_p2)
}
   0xa   :  { %s2558_s27 = scalar_lea.vmem %s31_s19, 384  ;;  %p2563_p4 = scmp.lt.s32.totalorder %s31_s19, %s31_s19 }
   0xb   :  { %p2559_p3 = scmp.ne.s32.totalorder %s31_s19, %s2558_s27  ;;  %p2564_p5 = scmp.lt.s32.totalorder %s2558_s27, %s2558_s27 }
   0xd   :  { %p2565_p6 = por %p2564_p5, %p2563_p4 }
   0xf   :  { %p2566_p7 = pnand %p2565_p6, %p2559_p3 }
  0x11   :  { %2569 = shalt.err (!%p2566_p7)
}
  0x12   :  { %33 = dma.hbm_to_vmem [thread:$0]  %s2875_s1, 384, %s31_s19, [#allocation6]  }
  0x13   :  { %s2689_s30 = smov [#allocation8]   ;;  %s2690_s7 = smov [#allocation2]  }
  0x14   :  { %s51_s6 = sshll.u32 %s2689_s30, 4  ;;  %s20_s8 = sshll.u32 %s2690_s7, 4  ;;  %s52_s6 = int_to_ptr.vmem [resolvable:$true] %s51_s6  ;;  %s21_s8 = int_to_ptr.vmem [resolvable:$true] %s20_s8 }
  0x15   :  { %s2570_s11 = scalar_lea.hbm %s2877_s3, 4096 }
  0x16   :  { %p2571_p8 = scmp.ne.s32.totalorder %s2877_s3, %s2570_s11  ;;  %p2574_p9 = scmp.lt.u32.totalorder %s2570_s11, %s2877_s3 }
  0x18   :  { %p2576_p10 = pnand %p2574_p9, %p2571_p8 }
  0x1a   :  { %2579 = shalt.err (!%p2576_p10)
}
  0x1b   :  { %s2580_s1 = scalar_lea.vmem %s52_s6, 4096  ;;  %p2585_p12 = scmp.lt.s32.totalorder %s52_s6, %s52_s6 }
  0x1c   :  { %p2581_p11 = scmp.ne.s32.totalorder %s52_s6, %s2580_s1  ;;  %p2586_p13 = scmp.lt.s32.totalorder %s2580_s1, %s2580_s1 }
  0x1e   :  { %p2587_p0 = por %p2586_p13, %p2585_p12 }
  0x20   :  { %p2588_p1 = pnand %p2587_p0, %p2581_p11 }
  0x22   :  { %2591 = shalt.err (!%p2588_p1)
}
  0x23   :  { %s2691_s16 = smov 128   ;;  %s2692_s17 = smov 8  }
  0x24   :  { %57 = dma.hbm_to_vmem [thread:$0]  %s2877_s3, 4096, %s52_s6, [#allocation9], %s2691_s16, %s2691_s16, %s2692_s17  }
  0x25   :  { %s2592_s22 = scalar_lea.hbm %s2874_s0, 256 }
  0x26   :  { %p2593_p2 = scmp.ne.s32.totalorder %s2874_s0, %s2592_s22  ;;  %p2596_p3 = scmp.lt.u32.totalorder %s2592_s22, %s2874_s0 }
  0x28   :  { %p2598_p4 = pnand %p2596_p3, %p2593_p2 }
  0x2a   :  { %2601 = shalt.err (!%p2598_p4)
}
  0x2b   :  { %s2602_s27 = scalar_lea.vmem %s21_s8, 256  ;;  %p2607_p6 = scmp.lt.s32.totalorder %s21_s8, %s21_s8 }
  0x2c   :  { %p2603_p5 = scmp.ne.s32.totalorder %s21_s8, %s2602_s27  ;;  %p2608_p7 = scmp.lt.s32.totalorder %s2602_s27, %s2602_s27 }
  0x2e   :  { %p2609_p8 = por %p2608_p7, %p2607_p6 }
  0x30   :  { %p2610_p9 = pnand %p2609_p8, %p2603_p5 }
  0x32   :  { %2613 = shalt.err (!%p2610_p9)
}
  0x33   :  { %23 = dma.hbm_to_vmem [thread:$0]  %s2874_s0, 256, %s21_s8, [#allocation3]  }
  0x34   :  { %s2693_s29 = smov [#allocation7]   ;;  %s2694_s6 = smov [#allocation10]  }
  0x35   :  { %s39_s30 = sshll.u32 %s2693_s29, 4  ;;  %s63_s7 = sshll.u32 %s2694_s6, 4  ;;  %s40_s30 = int_to_ptr.vmem [resolvable:$true] %s39_s30  ;;  %s64_s7 = int_to_ptr.vmem [resolvable:$true] %s63_s7 }
  0x36   :  { %s2614_s11 = scalar_lea.hbm %s2876_s2, 16384 }
  0x37   :  { %p2615_p10 = scmp.ne.s32.totalorder %s2876_s2, %s2614_s11  ;;  %p2618_p11 = scmp.lt.u32.totalorder %s2614_s11, %s2876_s2 }
  0x39   :  { %p2620_p12 = pnand %p2618_p11, %p2615_p10 }
  0x3b   :  { %2623 = shalt.err (!%p2620_p12)
}
  0x3c   :  { %s2624_s0 = scalar_lea.vmem %s40_s30, 16384  ;;  %p2629_p0 = scmp.lt.s32.totalorder %s40_s30, %s40_s30 }
  0x3d   :  { %p2625_p13 = scmp.ne.s32.totalorder %s40_s30, %s2624_s0  ;;  %p2630_p1 = scmp.lt.s32.totalorder %s2624_s0, %s2624_s0 }
  0x3f   :  { %p2631_p2 = por %p2630_p1, %p2629_p0 }
  0x41   :  { %p2632_p3 = pnand %p2631_p2, %p2625_p13 }
  0x43   :  { %2635 = shalt.err (!%p2632_p3)
}
  0x44   :  { %45 = dma.hbm_to_vmem [thread:$0]  %s2876_s2, 16384, %s40_s30, [#allocation6], %s2691_s16, %s2691_s16, %s2692_s17  }
  0x45   :  { %s2636_s20 = scalar_lea.hbm %s2878_s4, 8192 }
  0x46   :  { %p2637_p4 = scmp.ne.s32.totalorder %s2878_s4, %s2636_s20  ;;  %p2640_p5 = scmp.lt.u32.totalorder %s2636_s20, %s2878_s4 }
  0x48   :  { %p2642_p6 = pnand %p2640_p5, %p2637_p4 }
  0x4a   :  { %2645 = shalt.err (!%p2642_p6)
}
  0x4b   :  { %s2646_s25 = scalar_lea.vmem %s64_s7, 8192  ;;  %p2651_p8 = scmp.lt.s32.totalorder %s64_s7, %s64_s7 }
  0x4c   :  { %p2647_p7 = scmp.ne.s32.totalorder %s64_s7, %s2646_s25  ;;  %p2652_p9 = scmp.lt.s32.totalorder %s2646_s25, %s2646_s25 }
  0x4e   :  { %p2653_p10 = por %p2652_p9, %p2651_p8 }
  0x50   :  { %p2654_p11 = pnand %p2653_p10, %p2647_p7 }
  0x52   :  { %2657 = shalt.err (!%p2654_p11)
}
  0x53   :  { %s2695_s2 = smov 256   ;;  %s2696_s16 = smov 16  }
  0x54   :  { %69 = dma.hbm_to_vmem [thread:$0]  %s2878_s4, 8192, %s64_s7, [#allocation9], %s2695_s2, %s2695_s2, %s2696_s16  }
  0x55   :  { %2680 = dma.done.wait [#allocation3], 256  }
  0x56   :  { %2681 = vsyncadd [#allocation3], 4294967040 }
  0x57   :  { %2682 = dma.done.wait [#allocation6], 16768  }
  0x58   :  { %2683 = vsyncadd [#allocation6], 4294950528 }
  0x59   :  { %2684 = dma.done.wait [#allocation9], 12288  }
  0x5a   :  { %2685 = vsyncadd [#allocation9], 4294955008  ;;  %v2210_v0 = vld [vmem:[#allocation7 + $0x4] ss:$8 sps:$4 sm:$0xff]   ;;  %v2212_v1 = vld [vmem:[#allocation7] ss:$8 sps:$4 sm:$0xff]   ;;  %v93_v7 = vlaneseq }
  0x5b   :  { %1001 = vmatprep.subr.bf16.mxu0 %v2210_v0  ;;  %v2213_v2 = vld [vmem:[#allocation7 + $0x14] ss:$8 sps:$4 sm:$0xff]   ;;  %v2215_v3 = vld [vmem:[#allocation7 + $0x10] ss:$8 sps:$4 sm:$0xff]   ;;  %v2216_v4 = vld [vmem:[#allocation7 + $0x24] ss:$8 sps:$4 sm:$0xff]  }
  0x5c   :  { %1002 = vmatpush1.bf16.msra.mxu0 %v2212_v1  ;;  %v2218_v5 = vld [vmem:[#allocation7 + $0x20] ss:$8 sps:$4 sm:$0xff]   ;;  %v2219_v6 = vld [vmem:[#allocation7 + $0x34] ss:$8 sps:$4 sm:$0xff]   ;;  %v2221_v8 = vld [vmem:[#allocation7 + $0x30] ss:$8 sps:$4 sm:$0xff]  }
  0x5d   :  { %1003 = vmatprep.subr.bf16.mxu0 %v2213_v2  ;;  %v2222_v9 = vld [vmem:[#allocation7 + $0x44] ss:$8 sps:$4 sm:$0xff]   ;;  %v2794_v10 = vshrl.u32 %v93_v7, 7  ;;  %v2224_v11 = vld [vmem:[#allocation7 + $0x40] ss:$8 sps:$4 sm:$0xff]   ;;  %v2803_v18 = vld [vmem:[#allocation5 + $0x8] sm:$0xff] }
  0x5e   :  { %v2225_v12 = vld [vmem:[#allocation7 + $0x54] ss:$8 sps:$4 sm:$0xff]   ;;  %v2227_v14 = vld [vmem:[#allocation7 + $0x50] ss:$8 sps:$4 sm:$0xff]   ;;  %v2228_v15 = vld [vmem:[#allocation7 + $0x64] ss:$8 sps:$4 sm:$0xff]  }
  0x5f   :  { %v2797_v13 = vsub.s32 1, %v2794_v10  ;;  %v2799_v16 = vld [vmem:[#allocation2 + $0x8] sm:$0xff]  ;;  %v2801_v17 = vld [vmem:[#allocation5] sm:$0xff]  ;;  %v2231_v22 = vld [vmem:[#allocation7 + $0x74] ss:$8 sps:$4 sm:$0xff]   ;;  %v2811_v33 = vsub.s32 0, %v2794_v10 }
  0x60   :  { %1004 = vmatpush1.bf16.msra.mxu0 %v2215_v3  ;;  %v2230_v20 = vld [vmem:[#allocation7 + $0x60] ss:$8 sps:$4 sm:$0xff]   ;;  %v2233_v25 = vld [vmem:[#allocation7 + $0x70] ss:$8 sps:$4 sm:$0xff]   ;;  %v2234_v26 = vld [vmem:[#allocation7 + $0x84] ss:$8 sps:$4 sm:$0xff]  }
  0x61   :  { %1005 = vmatprep.subr.bf16.mxu0 %v2216_v4  ;;  %v100_v19 = vrot.slane %v2801_v17, %v2797_v13  ;;  %v149_v21 = vrot.slane %v2803_v18, %v2797_v13  ;;  %v2236_v29 = vld [vmem:[#allocation7 + $0x80] ss:$8 sps:$4 sm:$0xff]   ;;  %v2237_v30 = vld [vmem:[#allocation7 + $0x94] ss:$8 sps:$4 sm:$0xff]   ;;  %v2239_v34 = vld [vmem:[#allocation7 + $0x90] ss:$8 sps:$4 sm:$0xff]   ;;  %v96_v38 = vrot.slane %v2801_v17, %v2811_v33  ;;  %v145_v43 = vrot.slane %v2803_v18, %v2811_v33 }
  0x62   :  { %v2814_v35 = vsub.s32 3, %v2794_v10  ;;  %v2240_v36 = vld [vmem:[#allocation7 + $0xa4] ss:$8 sps:$4 sm:$0xff]   ;;  %v2242_v37 = vld [vmem:[#allocation7 + $0xa0] ss:$8 sps:$4 sm:$0xff]   ;;  %v2818_v39 = vld [vmem:[#allocation2] sm:$0xff] }
  0x63   :  { %v134_v23 = vmul.f32 %v100_v19, %v2799_v16  ;;  %v2243_v41 = vld [vmem:[#allocation7 + $0xb4] ss:$8 sps:$4 sm:$0xff]   ;;  %v133_v42 = vmul.f32 %v96_v38, %v2818_v39  ;;  %v2245_v44 = vld [vmem:[#allocation7 + $0xb0] ss:$8 sps:$4 sm:$0xff]   ;;  %v2246_v47 = vld [vmem:[#allocation7 + $0xc4] ss:$8 sps:$4 sm:$0xff]  }
  0x64   :  { %1006 = vmatpush1.bf16.msra.mxu0 %v2218_v5  ;;  %v108_v40 = vrot.slane %v2801_v17, %v2814_v35  ;;  %v157_v46 = vrot.slane %v2803_v18, %v2814_v35  ;;  %v2248_v49 = vld [vmem:[#allocation7 + $0xc0] ss:$8 sps:$4 sm:$0xff]   ;;  %v2249_v51 = vld [vmem:[#allocation7 + $0xd4] ss:$8 sps:$4 sm:$0xff]   ;;  %v2251_v53 = vld [vmem:[#allocation7 + $0xd0] ss:$8 sps:$4 sm:$0xff]  }
  0x65   :  { %1007 = vmatprep.subr.bf16.mxu0 %v2219_v6  ;;  %v183_v24 = vadd.f32 %v149_v21, %v134_v23  ;;  %v182_v48 = vadd.f32 %v145_v43, %v133_v42  ;;  %v2252_v55 = vld [vmem:[#allocation7 + $0xe4] ss:$8 sps:$4 sm:$0xff]   ;;  %v2254_v57 = vld [vmem:[#allocation7 + $0xe0] ss:$8 sps:$4 sm:$0xff]   ;;  %v2255_v59 = vld [vmem:[#allocation7 + $0xf4] ss:$8 sps:$4 sm:$0xff]  }
  0x66   :  { %v136_v45 = vmul.f32 %v108_v40, %v2799_v16  ;;  %v2257_v61 = vld [vmem:[#allocation7 + $0xf0] ss:$8 sps:$4 sm:$0xff]   ;;  %v2260_v63 = vld [vmem:[#allocation7 + $0x104] ss:$8 sps:$4 sm:$0xff]   ;;  %v2258_v1 = vld [vmem:[#allocation7 + $0x100] ss:$8 sps:$4 sm:$0xff]  }
  0x67   :  { %v2185_v27 = vround.rtne.f32 %v183_v24  ;;  %v2184_v52 = vround.rtne.f32 %v182_v48  ;;  %v2263_v3 = vld [vmem:[#allocation7 + $0x114] ss:$8 sps:$4 sm:$0xff]   ;;  %v2261_v4 = vld [vmem:[#allocation7 + $0x110] ss:$8 sps:$4 sm:$0xff]   ;;  %v2266_v5 = vld [vmem:[#allocation7 + $0x124] ss:$8 sps:$4 sm:$0xff]  }
  0x68   :  { %1008 = vmatpush1.bf16.msra.mxu0 %v2221_v8  ;;  %v185_v50 = vadd.f32 %v157_v46, %v136_v45  ;;  %v2264_v6 = vld [vmem:[#allocation7 + $0x120] ss:$8 sps:$4 sm:$0xff]   ;;  %v2269_v7 = vld [vmem:[#allocation7 + $0x134] ss:$8 sps:$4 sm:$0xff]   ;;  %v2267_v8 = vld [vmem:[#allocation7 + $0x130] ss:$8 sps:$4 sm:$0xff]  }
  0x69   :  { %1009 = vmatprep.subr.bf16.mxu0 %v2222_v9  ;;  %v199_v28 = vmax.f32 %v2185_v27, -2.0  ;;  %v198_v56 = vmax.f32 %v2184_v52, -2.0  ;;  %v2272_v9 = vld [vmem:[#allocation7 + $0x144] ss:$8 sps:$4 sm:$0xff]   ;;  %v2276_v19 = vld [vmem:[#allocation7 + $0x160] ss:$8 sps:$4 sm:$0xff]  }
  0x6a   :  { %v2187_v54 = vround.rtne.f32 %v185_v50  ;;  %v2279_v21 = vld [vmem:[#allocation7 + $0x170] ss:$8 sps:$4 sm:$0xff]   ;;  %v2282_v23 = vld [vmem:[#allocation7 + $0x180] ss:$8 sps:$4 sm:$0xff]   ;;  %v2287_v24 = vld [vmem:[#allocation7 + $0x194] ss:$8 sps:$4 sm:$0xff]  }
  0x6b   :  { %v207_v31 = vmin.f32 %v199_v28, 1.0  ;;  %v206_v60 = vmin.f32 %v198_v56, 1.0  ;;  %v2290_v27 = vld [vmem:[#allocation7 + $0x1a4] ss:$8 sps:$4 sm:$0xff]   ;;  %v115_v28 = vsub.s32 5, %v2794_v10  ;;  %s2697_s4 = smov [#allocation11]  }
  0x6c   :  { %1010 = vmatpush1.bf16.msra.mxu0 %v2224_v11  ;;  %v201_v58 = vmax.f32 %v2187_v54, -2.0  ;;  %v2270_v11 = vld [vmem:[#allocation7 + $0x140] ss:$8 sps:$4 sm:$0xff]   ;;  %v2296_v38 = vld [vmem:[#allocation7 + $0x1c4] ss:$8 sps:$4 sm:$0xff]   ;;  %s1935_s27 = sshll.u32 %s2697_s4, 4  ;;  %s1936_s27 = int_to_ptr.vmem [resolvable:$true] %s1935_s27 }
  0x6d   :  { %1011 = vmatprep.subr.bf16.mxu0 %v2225_v12  ;;  %v215_v32 = vpack.c.bf16 %v207_v31, %v207_v31  ;;  %v214_v0 = vpack.c.bf16 %v206_v60, %v206_v60  ;;  %v2275_v12 = vld [vmem:[#allocation7 + $0x154] ss:$8 sps:$4 sm:$0xff]   ;;  %v2294_v43 = vld [vmem:[#allocation7 + $0x1c0] ss:$8 sps:$4 sm:$0xff]   ;;  %v2302_v48 = vld [vmem:[#allocation7 + $0x1e4] ss:$8 sps:$4 sm:$0xff]   ;;  %p2663_p13 = scmp.lt.s32.totalorder %s1936_s27, %s1936_s27 }
  0x6e   :  { %v209_v62 = vmin.f32 %v201_v58, 1.0  ;;  %v2293_v31 = vld [vmem:[#allocation7 + $0x1b4] ss:$8 sps:$4 sm:$0xff]   ;;  %s2658_s3 = scalar_lea.vmem %s1936_s27, 128 }
  0x6f   :  { %1033 = vmatprep.mubr.bf16.mxu0 %v215_v32  ;;  %v116_v32 = vrot.slane %v2801_v17, %v115_v28  ;;  %p2659_p12 = scmp.ne.s32.totalorder %s1936_s27, %s2658_s3  ;;  %p2664_p0 = scmp.lt.s32.totalorder %s2658_s3, %s2658_s3 }
  0x70   :  { %1012 = vmatpush1.bf16.msra.mxu0 %v2227_v14  ;;  %v217_v2 = vpack.c.bf16 %v209_v62, %v209_v62  ;;  %v2273_v14 = vld [vmem:[#allocation7 + $0x150] ss:$8 sps:$4 sm:$0xff]   ;;  %v2402_v62 = vld [vmem:[#allocation8 + $0x4] ss:$8 sps:$4 sm:$0xff]  }
  0x71   :  { %1013 = vmatprep.subr.bf16.mxu0 %v2228_v15  ;;  %v2278_v15 = vld [vmem:[#allocation7 + $0x164] ss:$8 sps:$4 sm:$0xff]   ;;  %v138_v40 = vmul.f32 %v116_v32, %v2799_v16  ;;  %1376 = vmatprep.subr.bf16.mxu1 %v2402_v62  ;;  %v2342_v62 = vld [vmem:[#allocation7 + $0x2c0] ss:$8 sps:$4 sm:$0xff]   ;;  %p2665_p1 = por %p2664_p0, %p2663_p13 }
  0x72   :  { %v2332_v32 = vld [vmem:[#allocation7 + $0x284] ss:$8 sps:$4 sm:$0xff]  }
  0x73   :  { %p2666_p2 = pnand %p2665_p1, %p2659_p12 }
  0x74   :  { %1014 = vmatpush1.bf16.msra.mxu0 %v2230_v20  ;;  %v2281_v20 = vld [vmem:[#allocation7 + $0x174] ss:$8 sps:$4 sm:$0xff]  }
  0x75   :  { %1015 = vmatprep.subr.bf16.mxu0 %v2231_v22  ;;  %v2284_v22 = vld [vmem:[#allocation7 + $0x184] ss:$8 sps:$4 sm:$0xff]  }
  0x78   :  { %1016 = vmatpush1.bf16.msra.mxu0 %v2233_v25  ;;  %v2829_v25 = vsub.s32 2, %v2794_v10 }
  0x79   :  { %1017 = vmatprep.subr.bf16.mxu0 %v2234_v26  ;;  %v2285_v26 = vld [vmem:[#allocation7 + $0x190] ss:$8 sps:$4 sm:$0xff]  }
  0x7c   :  { %1018 = vmatpush1.bf16.msra.mxu0 %v2236_v29  ;;  %v104_v29 = vrot.slane %v2801_v17, %v2829_v25 }
  0x7d   :  { %1019 = vmatprep.subr.bf16.mxu0 %v2237_v30  ;;  %v2288_v30 = vld [vmem:[#allocation7 + $0x1a0] ss:$8 sps:$4 sm:$0xff]  }
  0x80   :  { %1020 = vmatpush1.bf16.msra.mxu0 %v2239_v34  ;;  %v135_v34 = vmul.f32 %v104_v29, %v2818_v39  ;;  %v2422_v29 = vld [vmem:[#allocation8 + $0x60] ss:$8 sps:$4 sm:$0xff]  }
  0x81   :  { %1021 = vmatprep.subr.bf16.mxu0 %v2240_v36  ;;  %v153_v36 = vrot.slane %v2803_v18, %v2829_v25 }
  0x83   :  { %v184_v42 = vadd.f32 %v153_v36, %v135_v34  ;;  %v2425_v34 = vld [vmem:[#allocation8 + $0x70] ss:$8 sps:$4 sm:$0xff]   ;;  %v2426_v36 = vld [vmem:[#allocation8 + $0x84] ss:$8 sps:$4 sm:$0xff]  }
  0x84   :  { %1022 = vmatpush1.bf16.msra.mxu0 %v2242_v37  ;;  %v2291_v37 = vld [vmem:[#allocation7 + $0x1b0] ss:$8 sps:$4 sm:$0xff]  }
  0x85   :  { %1023 = vmatprep.subr.bf16.mxu0 %v2243_v41  ;;  %v165_v41 = vrot.slane %v2803_v18, %v115_v28  ;;  %v2186_v46 = vround.rtne.f32 %v184_v42  ;;  %v2329_v28 = vld [vmem:[#allocation7 + $0x274] ss:$8 sps:$4 sm:$0xff]  }
  0x86   :  { %v2429_v42 = vld [vmem:[#allocation8 + $0x94] ss:$8 sps:$4 sm:$0xff]  }
  0x87   :  { %v187_v45 = vadd.f32 %v165_v41, %v138_v40  ;;  %v200_v50 = vmax.f32 %v2186_v46, -2.0  ;;  %v2428_v40 = vld [vmem:[#allocation8 + $0x80] ss:$8 sps:$4 sm:$0xff]   ;;  %v111_v41 = vsub.s32 4, %v2794_v10  ;;  %v2431_v46 = vld [vmem:[#allocation8 + $0x90] ss:$8 sps:$4 sm:$0xff]  }
  0x88   :  { %1024 = vmatpush1.bf16.msra.mxu0 %v2245_v44  ;;  %v2299_v44 = vld [vmem:[#allocation7 + $0x1d4] ss:$8 sps:$4 sm:$0xff]  }
  0x89   :  { %1025 = vmatprep.subr.bf16.mxu0 %v2246_v47  ;;  %v2297_v47 = vld [vmem:[#allocation7 + $0x1d0] ss:$8 sps:$4 sm:$0xff]   ;;  %v208_v54 = vmin.f32 %v200_v50, 1.0 }
  0x8b   :  { %v216_v58 = vpack.c.bf16 %v208_v54, %v208_v54  ;;  %v161_v54 = vrot.slane %v2803_v18, %v111_v41 }
  0x8c   :  { %1026 = vmatpush1.bf16.msra.mxu0 %v2248_v49  ;;  %v2189_v49 = vround.rtne.f32 %v187_v45  ;;  %v2338_v45 = vld [vmem:[#allocation7 + $0x2a4] ss:$8 sps:$4 sm:$0xff]  }
  0x8d   :  { %1027 = vmatprep.subr.bf16.mxu0 %v2249_v51  ;;  %v2300_v51 = vld [vmem:[#allocation7 + $0x1e0] ss:$8 sps:$4 sm:$0xff]  }
  0x8e   :  { %v203_v52 = vmax.f32 %v2189_v49, -2.0  ;;  %v2336_v49 = vld [vmem:[#allocation7 + $0x2a0] ss:$8 sps:$4 sm:$0xff]  }
  0x90   :  { %1028 = vmatpush1.bf16.msra.mxu0 %v2251_v53  ;;  %v2305_v53 = vld [vmem:[#allocation7 + $0x1f4] ss:$8 sps:$4 sm:$0xff]   ;;  %v211_v56 = vmin.f32 %v203_v52, 1.0  ;;  %v2434_v52 = vld [vmem:[#allocation8 + $0xa0] ss:$8 sps:$4 sm:$0xff]  }
  0x91   :  { %1029 = vmatprep.subr.bf16.mxu0 %v2252_v55  ;;  %v2303_v55 = vld [vmem:[#allocation7 + $0x1f0] ss:$8 sps:$4 sm:$0xff]  }
  0x92   :  { %v219_v60 = vpack.c.bf16 %v211_v56, %v211_v56  ;;  %v2339_v56 = vld [vmem:[#allocation7 + $0x2b0] ss:$8 sps:$4 sm:$0xff]  }
  0x94   :  { %1030 = vmatpush1.bf16.msra.mxu0 %v2254_v57  ;;  %v2308_v57 = vld [vmem:[#allocation7 + $0x204] ss:$8 sps:$4 sm:$0xff]  }
  0x95   :  { %1031 = vmatprep.subr.bf16.mxu0 %v2255_v59  ;;  %v2306_v59 = vld [vmem:[#allocation7 + $0x200] ss:$8 sps:$4 sm:$0xff]  }
  0x98   :  { %1032 = vmatpush1.bf16.msra.mxu0 %v2257_v61  ;;  %v2311_v61 = vld [vmem:[#allocation7 + $0x214] ss:$8 sps:$4 sm:$0xff]  }
  0x99   :  { %1042 = vmatprep.subr.bf16.mxu0 %v2260_v63  ;;  %v2404_v63 = vld [vmem:[#allocation8] ss:$8 sps:$4 sm:$0xff]  }
  0x9a   :  { %1377 = vmatpush1.bf16.msra.mxu1 %v2404_v63 }
  0x9b   :  { %1034 = vmatmul.mubr.bf16.vlgmr.msra.gmra.mrb[0].mxu0 %v214_v0  ;;  %v2405_v0 = vld [vmem:[#allocation8 + $0x14] ss:$8 sps:$4 sm:$0xff]  }
  0x9c   :  { %1043 = vmatpush1.bf16.msra.mxu0 %v2258_v1  ;;  %1074 = vmatprep.mubr.bf16.mxu0 %v217_v2  ;;  %v2309_v1 = vld [vmem:[#allocation7 + $0x210] ss:$8 sps:$4 sm:$0xff]   ;;  %v2314_v2 = vld [vmem:[#allocation7 + $0x224] ss:$8 sps:$4 sm:$0xff]  }
  0x9d   :  { %1044 = vmatprep.subr.bf16.mxu0 %v2263_v3  ;;  %v2407_v3 = vld [vmem:[#allocation8 + $0x10] ss:$8 sps:$4 sm:$0xff]   ;;  %1378 = vmatprep.subr.bf16.mxu1 %v2405_v0  ;;  %v2347_v0 = vld [vmem:[#allocation7 + $0x2d4] ss:$8 sps:$4 sm:$0xff]  }
  0x9e   :  { %1379 = vmatpush1.bf16.msra.mxu1 %v2407_v3 }
  0xa0   :  { %1045 = vmatpush1.bf16.msra.mxu0 %v2261_v4  ;;  %v2408_v4 = vld [vmem:[#allocation8 + $0x24] ss:$8 sps:$4 sm:$0xff]  }
  0xa1   :  { %1046 = vmatprep.subr.bf16.mxu0 %v2266_v5  ;;  %v2312_v5 = vld [vmem:[#allocation7 + $0x220] ss:$8 sps:$4 sm:$0xff]   ;;  %1380 = vmatprep.subr.bf16.mxu1 %v2408_v4 }
  0xa4   :  { %1047 = vmatpush1.bf16.msra.mxu0 %v2264_v6  ;;  %v2317_v6 = vld [vmem:[#allocation7 + $0x234] ss:$8 sps:$4 sm:$0xff]  }
  0xa5   :  { %1048 = vmatprep.subr.bf16.mxu0 %v2269_v7  ;;  %v2410_v7 = vld [vmem:[#allocation8 + $0x20] ss:$8 sps:$4 sm:$0xff]  }
  0xa6   :  { %1381 = vmatpush1.bf16.msra.mxu1 %v2410_v7  ;;  %v2353_v7 = vld [vmem:[#allocation7 + $0x2f4] ss:$8 sps:$4 sm:$0xff]  }
  0xa8   :  { %1049 = vmatpush1.bf16.msra.mxu0 %v2267_v8  ;;  %v2411_v8 = vld [vmem:[#allocation8 + $0x34] ss:$8 sps:$4 sm:$0xff]  }
  0xa9   :  { %1050 = vmatprep.subr.bf16.mxu0 %v2272_v9  ;;  %v2315_v9 = vld [vmem:[#allocation7 + $0x230] ss:$8 sps:$4 sm:$0xff]   ;;  %1382 = vmatprep.subr.bf16.mxu1 %v2411_v8 }
  0xac   :  { %1051 = vmatpush1.bf16.msra.mxu0 %v2270_v11  ;;  %v2320_v11 = vld [vmem:[#allocation7 + $0x244] ss:$8 sps:$4 sm:$0xff]  }
  0xad   :  { %1052 = vmatprep.subr.bf16.mxu0 %v2275_v12  ;;  %v2413_v12 = vld [vmem:[#allocation8 + $0x30] ss:$8 sps:$4 sm:$0xff]  }
  0xae   :  { %1383 = vmatpush1.bf16.msra.mxu1 %v2413_v12  ;;  %v2356_v12 = vld [vmem:[#allocation7 + $0x304] ss:$8 sps:$4 sm:$0xff]  }
  0xb0   :  { %1053 = vmatpush1.bf16.msra.mxu0 %v2273_v14  ;;  %v2414_v14 = vld [vmem:[#allocation8 + $0x44] ss:$8 sps:$4 sm:$0xff]  }
  0xb1   :  { %1054 = vmatprep.subr.bf16.mxu0 %v2278_v15  ;;  %v2318_v15 = vld [vmem:[#allocation7 + $0x240] ss:$8 sps:$4 sm:$0xff]   ;;  %1384 = vmatprep.subr.bf16.mxu1 %v2414_v14 }
  0xb4   :  { %1055 = vmatpush1.bf16.msra.mxu0 %v2276_v19  ;;  %v2323_v19 = vld [vmem:[#allocation7 + $0x254] ss:$8 sps:$4 sm:$0xff]  }
  0xb5   :  { %1056 = vmatprep.subr.bf16.mxu0 %v2281_v20  ;;  %v2416_v20 = vld [vmem:[#allocation8 + $0x40] ss:$8 sps:$4 sm:$0xff]  }
  0xb6   :  { %1385 = vmatpush1.bf16.msra.mxu1 %v2416_v20  ;;  %v2359_v20 = vld [vmem:[#allocation7 + $0x314] ss:$8 sps:$4 sm:$0xff]  }
  0xb8   :  { %1057 = vmatpush1.bf16.msra.mxu0 %v2279_v21  ;;  %v2417_v21 = vld [vmem:[#allocation8 + $0x54] ss:$8 sps:$4 sm:$0xff]  }
  0xb9   :  { %1058 = vmatprep.subr.bf16.mxu0 %v2284_v22  ;;  %v2321_v22 = vld [vmem:[#allocation7 + $0x250] ss:$8 sps:$4 sm:$0xff]   ;;  %1386 = vmatprep.subr.bf16.mxu1 %v2417_v21 }
  0xba   :  { %v2357_v21 = vld [vmem:[#allocation7 + $0x310] ss:$8 sps:$4 sm:$0xff]  }
  0xbc   :  { %1059 = vmatpush1.bf16.msra.mxu0 %v2282_v23  ;;  %v2326_v23 = vld [vmem:[#allocation7 + $0x264] ss:$8 sps:$4 sm:$0xff]  }
  0xbd   :  { %1060 = vmatprep.subr.bf16.mxu0 %v2287_v24  ;;  %v2419_v24 = vld [vmem:[#allocation8 + $0x50] ss:$8 sps:$4 sm:$0xff]  }
  0xbe   :  { %1387 = vmatpush1.bf16.msra.mxu1 %v2419_v24  ;;  %v2365_v24 = vld [vmem:[#allocation7 + $0x334] ss:$8 sps:$4 sm:$0xff]  }
  0xc0   :  { %1061 = vmatpush1.bf16.msra.mxu0 %v2285_v26  ;;  %v2420_v26 = vld [vmem:[#allocation8 + $0x64] ss:$8 sps:$4 sm:$0xff]  }
  0xc1   :  { %1062 = vmatprep.subr.bf16.mxu0 %v2290_v27  ;;  %v2324_v27 = vld [vmem:[#allocation7 + $0x260] ss:$8 sps:$4 sm:$0xff]   ;;  %1388 = vmatprep.subr.bf16.mxu1 %v2420_v26  ;;  %v2363_v26 = vld [vmem:[#allocation7 + $0x330] ss:$8 sps:$4 sm:$0xff]  }
  0xc2   :  { %1389 = vmatpush1.bf16.msra.mxu1 %v2422_v29  ;;  %v2371_v29 = vld [vmem:[#allocation7 + $0x354] ss:$8 sps:$4 sm:$0xff]  }
  0xc4   :  { %1063 = vmatpush1.bf16.msra.mxu0 %v2288_v30  ;;  %v2423_v30 = vld [vmem:[#allocation8 + $0x74] ss:$8 sps:$4 sm:$0xff]  }
  0xc5   :  { %1064 = vmatprep.subr.bf16.mxu0 %v2293_v31  ;;  %v2327_v31 = vld [vmem:[#allocation7 + $0x270] ss:$8 sps:$4 sm:$0xff]   ;;  %1390 = vmatprep.subr.bf16.mxu1 %v2423_v30 }
  0xc6   :  { %1391 = vmatpush1.bf16.msra.mxu1 %v2425_v34  ;;  %v2369_v30 = vld [vmem:[#allocation7 + $0x350] ss:$8 sps:$4 sm:$0xff]   ;;  %v2377_v34 = vld [vmem:[#allocation7 + $0x374] ss:$8 sps:$4 sm:$0xff]  }
  0xc7   :  { %1392 = vmatprep.subr.bf16.mxu1 %v2426_v36  ;;  %v2375_v36 = vld [vmem:[#allocation7 + $0x370] ss:$8 sps:$4 sm:$0xff]  }
  0xc8   :  { %1065 = vmatpush1.bf16.msra.mxu0 %v2291_v37  ;;  %v2330_v37 = vld [vmem:[#allocation7 + $0x280] ss:$8 sps:$4 sm:$0xff]  }
  0xc9   :  { %1066 = vmatprep.subr.bf16.mxu0 %v2296_v38  ;;  %v2335_v38 = vld [vmem:[#allocation7 + $0x294] ss:$8 sps:$4 sm:$0xff]  }
  0xca   :  { %1393 = vmatpush1.bf16.msra.mxu1 %v2428_v40  ;;  %v2383_v40 = vld [vmem:[#allocation7 + $0x394] ss:$8 sps:$4 sm:$0xff]  }
  0xcb   :  { %1394 = vmatprep.subr.bf16.mxu1 %v2429_v42  ;;  %v2381_v42 = vld [vmem:[#allocation7 + $0x390] ss:$8 sps:$4 sm:$0xff]  }
  0xcc   :  { %1067 = vmatpush1.bf16.msra.mxu0 %v2294_v43  ;;  %v2333_v43 = vld [vmem:[#allocation7 + $0x290] ss:$8 sps:$4 sm:$0xff]  }
  0xcd   :  { %1068 = vmatprep.subr.bf16.mxu0 %v2299_v44  ;;  %v123_v44 = vsub.s32 7, %v2794_v10 }
  0xce   :  { %1395 = vmatpush1.bf16.msra.mxu1 %v2431_v46  ;;  %v2384_v46 = vld [vmem:[#allocation7 + $0x3a0] ss:$8 sps:$4 sm:$0xff]  }
  0xcf   :  { %v124_v50 = vrot.slane %v2801_v17, %v123_v44 }
  0xd0   :  { %1069 = vmatpush1.bf16.msra.mxu0 %v2297_v47  ;;  %v112_v47 = vrot.slane %v2801_v17, %v111_v41  ;;  %v2437_v17 = vld [vmem:[#allocation8 + $0xb0] ss:$8 sps:$4 sm:$0xff]   ;;  %v119_v41 = vsub.s32 6, %v2794_v10  ;;  %v2390_v10 = vld [vmem:[#allocation7 + $0x3c0] ss:$8 sps:$4 sm:$0xff]  }
  0xd1   :  { %1070 = vmatprep.subr.bf16.mxu0 %v2302_v48  ;;  %v2432_v48 = vld [vmem:[#allocation8 + $0xa4] ss:$8 sps:$4 sm:$0xff]  }
  0xd2   :  { %1396 = vmatprep.subr.bf16.mxu1 %v2432_v48 }
  0xd3   :  { %1397 = vmatpush1.bf16.msra.mxu1 %v2434_v52  ;;  %v2392_v52 = vld [vmem:[#allocation7 + $0x3c4] ss:$8 sps:$4 sm:$0xff]  }
  0xd4   :  { %1071 = vmatpush1.bf16.msra.mxu0 %v2300_v51  ;;  %v2341_v51 = vld [vmem:[#allocation7 + $0x2b4] ss:$8 sps:$4 sm:$0xff]  }
  0xd5   :  { %1072 = vmatprep.subr.bf16.mxu0 %v2305_v53  ;;  %v137_v53 = vmul.f32 %v112_v47, %v2818_v39  ;;  %v2389_v47 = vld [vmem:[#allocation7 + $0x3b4] ss:$8 sps:$4 sm:$0xff]  }
  0xd8   :  { %1073 = vmatpush1.bf16.msra.mxu0 %v2303_v55  ;;  %v2435_v55 = vld [vmem:[#allocation8 + $0xb4] ss:$8 sps:$4 sm:$0xff]  }
  0xd9   :  { %1083 = vmatprep.subr.bf16.mxu0 %v2308_v57  ;;  %v140_v57 = vmul.f32 %v124_v50, %v2799_v16  ;;  %1398 = vmatprep.subr.bf16.mxu1 %v2435_v55  ;;  %v2345_v16 = vld [vmem:[#allocation7 + $0x2d0] ss:$8 sps:$4 sm:$0xff]  }
  0xda   :  { %1399 = vmatpush1.bf16.msra.mxu1 %v2437_v17 }
  0xdb   :  { %1075 = vmatmul.mubr.bf16.vlgmr.msra.gmra.mrb[0].mxu0 %v216_v58  ;;  %v173_v58 = vrot.slane %v2803_v18, %v123_v44  ;;  %v2350_v18 = vld [vmem:[#allocation7 + $0x2e4] ss:$8 sps:$4 sm:$0xff]  }
  0xdc   :  { %1084 = vmatpush1.bf16.msra.mxu0 %v2306_v59  ;;  %1115 = vmatprep.mubr.bf16.mxu0 %v219_v60  ;;  %v2344_v59 = vld [vmem:[#allocation7 + $0x2c4] ss:$8 sps:$4 sm:$0xff]   ;;  %v186_v60 = vadd.f32 %v161_v54, %v137_v53  ;;  %v2395_v54 = vld [vmem:[#allocation7 + $0x3d4] ss:$8 sps:$4 sm:$0xff]  }
  0xdd   :  { %1085 = vmatprep.subr.bf16.mxu0 %v2311_v61  ;;  %v2438_v61 = vld [vmem:[#allocation8 + $0xc4] ss:$8 sps:$4 sm:$0xff]   ;;  %v189_v63 = vadd.f32 %v173_v58, %v140_v57 }
  0xde   :  { %1400 = vmatprep.subr.bf16.mxu1 %v2438_v61  ;;  %v2546_v44 = vld [vmem:[#allocation5] sm:$0xff] }
  0xdf   :  { %v2191_v3 = vround.rtne.f32 %v189_v63  ;;  %v2398_v57 = vld [vmem:[#allocation7 + $0x3e4] ss:$8 sps:$4 sm:$0xff]   ;;  %v2443_v63 = vld [vmem:[#allocation8 + $0xd0] ss:$8 sps:$4 sm:$0xff]  }
  0xe0   :  { %1086 = vmatpush1.bf16.msra.mxu0 %v2309_v1  ;;  %v2440_v1 = vld [vmem:[#allocation8 + $0xc0] ss:$8 sps:$4 sm:$0xff]  }
  0xe1   :  { %1087 = vmatprep.subr.bf16.mxu0 %v2314_v2  ;;  %v2188_v2 = vround.rtne.f32 %v186_v60  ;;  %1401 = vmatpush1.bf16.msra.mxu1 %v2440_v1  ;;  %v2399_v60 = vld [vmem:[#allocation7 + $0x3f0] ss:$8 sps:$4 sm:$0xff]   ;;  %v2446_v1 = vld [vmem:[#allocation8 + $0xe0] ss:$8 sps:$4 sm:$0xff]  }
  0xe3   :  { %v202_v4 = vmax.f32 %v2188_v2, -2.0  ;;  %v2447_v2 = vld [vmem:[#allocation8 + $0xf4] ss:$8 sps:$4 sm:$0xff]  }
  0xe4   :  { %1088 = vmatpush1.bf16.msra.mxu0 %v2312_v5  ;;  %v2348_v5 = vld [vmem:[#allocation7 + $0x2e0] ss:$8 sps:$4 sm:$0xff]  }
  0xe5   :  { %1089 = vmatprep.subr.bf16.mxu0 %v2317_v6  ;;  %v205_v6 = vmax.f32 %v2191_v3, -2.0  ;;  %v210_v8 = vmin.f32 %v202_v4, 1.0  ;;  %v2452_v3 = vld [vmem:[#allocation10 + $0x4] ss:$16 sps:$4 sm:$0xff]  }
  0xe7   :  { %v218_v14 = vpack.c.bf16 %v210_v8, %v210_v8 }
  0xe8   :  { %1090 = vmatpush1.bf16.msra.mxu0 %v2315_v9  ;;  %v2351_v9 = vld [vmem:[#allocation7 + $0x2f0] ss:$8 sps:$4 sm:$0xff]  }
  0xe9   :  { %1091 = vmatprep.subr.bf16.mxu0 %v2320_v11  ;;  %v213_v11 = vmin.f32 %v205_v6, 1.0 }
  0xec   :  { %1092 = vmatpush1.bf16.msra.mxu0 %v2318_v15  ;;  %v2354_v15 = vld [vmem:[#allocation7 + $0x300] ss:$8 sps:$4 sm:$0xff]  }
  0xed   :  { %1093 = vmatprep.subr.bf16.mxu0 %v2323_v19  ;;  %v221_v19 = vpack.c.bf16 %v213_v11, %v213_v11 }
  0xf0   :  { %1094 = vmatpush1.bf16.msra.mxu0 %v2321_v22  ;;  %v2362_v22 = vld [vmem:[#allocation7 + $0x324] ss:$8 sps:$4 sm:$0xff]  }
  0xf1   :  { %1095 = vmatprep.subr.bf16.mxu0 %v2326_v23  ;;  %v2360_v23 = vld [vmem:[#allocation7 + $0x320] ss:$8 sps:$4 sm:$0xff]  }
  0xf4   :  { %1096 = vmatpush1.bf16.msra.mxu0 %v2324_v27  ;;  %v2368_v27 = vld [vmem:[#allocation7 + $0x344] ss:$8 sps:$4 sm:$0xff]  }
  0xf5   :  { %1097 = vmatprep.subr.bf16.mxu0 %v2329_v28  ;;  %v2366_v28 = vld [vmem:[#allocation7 + $0x340] ss:$8 sps:$4 sm:$0xff]  }
  0xf8   :  { %1098 = vmatpush1.bf16.msra.mxu0 %v2327_v31  ;;  %v2374_v31 = vld [vmem:[#allocation7 + $0x364] ss:$8 sps:$4 sm:$0xff]  }
  0xf9   :  { %1099 = vmatprep.subr.bf16.mxu0 %v2332_v32  ;;  %v2372_v32 = vld [vmem:[#allocation7 + $0x360] ss:$8 sps:$4 sm:$0xff]  }
  0xfc   :  { %1100 = vmatpush1.bf16.msra.mxu0 %v2330_v37  ;;  %v2380_v37 = vld [vmem:[#allocation7 + $0x384] ss:$8 sps:$4 sm:$0xff]  }
  0xfd   :  { %1101 = vmatprep.subr.bf16.mxu0 %v2335_v38  ;;  %v2378_v38 = vld [vmem:[#allocation7 + $0x380] ss:$8 sps:$4 sm:$0xff]  }
 0x100   :  { %1102 = vmatpush1.bf16.msra.mxu0 %v2333_v43  ;;  %v2386_v43 = vld [vmem:[#allocation7 + $0x3a4] ss:$8 sps:$4 sm:$0xff]  }
 0x101   :  { %1103 = vmatprep.subr.bf16.mxu0 %v2338_v45  ;;  %v120_v45 = vrot.slane %v2546_v44, %v119_v41  ;;  %v2476_v44 = vld [vmem:[#allocation10 + $0x104] ss:$16 sps:$4 sm:$0xff]  }
 0x103   :  { %v139_v48 = vmul.f32 %v120_v45, %v2818_v39  ;;  %v2401_v39 = vld [vmem:[#allocation7 + $0x3f4] ss:$8 sps:$4 sm:$0xff]   ;;  %v2474_v45 = vld [vmem:[#allocation10 + $0x100] ss:$16 sps:$4 sm:$0xff]  }
 0x104   :  { %1104 = vmatpush1.bf16.msra.mxu0 %v2336_v49  ;;  %v2547_v49 = vld [vmem:[#allocation5 + $0x8] sm:$0xff] }
 0x105   :  { %1105 = vmatprep.subr.bf16.mxu0 %v2341_v51  ;;  %v169_v50 = vrot.slane %v2547_v49, %v119_v41  ;;  %v2387_v51 = vld [vmem:[#allocation7 + $0x3b0] ss:$8 sps:$4 sm:$0xff]  }
 0x106   :  { %v2468_v41 = vld [vmem:[#allocation10 + $0xc0] ss:$16 sps:$4 sm:$0xff]  }
 0x107   :  { %v188_v53 = vadd.f32 %v169_v50, %v139_v48  ;;  %v2482_v48 = vld [vmem:[#allocation10 + $0x144] ss:$16 sps:$4 sm:$0xff]   ;;  %v2480_v49 = vld [vmem:[#allocation10 + $0x140] ss:$16 sps:$4 sm:$0xff]  }
 0x108   :  { %1106 = vmatpush1.bf16.msra.mxu0 %v2339_v56  ;;  %v2393_v56 = vld [vmem:[#allocation7 + $0x3d0] ss:$8 sps:$4 sm:$0xff]   ;;  %v2485_v50 = vld [vmem:[#allocation10 + $0x164] ss:$16 sps:$4 sm:$0xff]  }
 0x109   :  { %1107 = vmatprep.subr.bf16.mxu0 %v2344_v59  ;;  %v2190_v55 = vround.rtne.f32 %v188_v53  ;;  %v2396_v59 = vld [vmem:[#allocation7 + $0x3e0] ss:$8 sps:$4 sm:$0xff]  }
 0x10a   :  { %v2486_v53 = vld [vmem:[#allocation10 + $0x180] ss:$16 sps:$4 sm:$0xff]  }
 0x10b   :  { %v204_v58 = vmax.f32 %v2190_v55, -2.0  ;;  %v2494_v55 = vld [vmem:[#allocation10 + $0x1c4] ss:$16 sps:$4 sm:$0xff]  }
 0x10c   :  { %1108 = vmatpush1.bf16.msra.mxu0 %v2342_v62  ;;  %v2441_v62 = vld [vmem:[#allocation8 + $0xd4] ss:$8 sps:$4 sm:$0xff]  }
 0x10d   :  { %1109 = vmatprep.subr.bf16.mxu0 %v2347_v0  ;;  %v212_v17 = vmin.f32 %v204_v58, 1.0  ;;  %1402 = vmatprep.subr.bf16.mxu1 %v2441_v62  ;;  %v2444_v0 = vld [vmem:[#allocation8 + $0xe4] ss:$8 sps:$4 sm:$0xff]   ;;  %v2495_v58 = vld [vmem:[#allocation10 + $0x1e0] ss:$16 sps:$4 sm:$0xff]  }
 0x10e   :  { %1403 = vmatpush1.bf16.msra.mxu1 %v2443_v63 }
 0x10f   :  { %v220_v61 = vpack.c.bf16 %v212_v17, %v212_v17  ;;  %1404 = vmatprep.subr.bf16.mxu1 %v2444_v0 }
 0x110   :  { %1110 = vmatpush1.bf16.msra.mxu0 %v2345_v16  ;;  %v2449_v16 = vld [vmem:[#allocation8 + $0xf0] ss:$8 sps:$4 sm:$0xff]  }
 0x111   :  { %1111 = vmatprep.subr.bf16.mxu0 %v2350_v18  ;;  %v89_v18 = vld [vmem:[#allocation5 + $0x10] sm:$0x3] }
 0x112   :  { %1405 = vmatpush1.bf16.msra.mxu1 %v2446_v1  ;;  %v354_v4 = vrot.slane %v89_v18, %v2811_v33 }
 0x113   :  { %1406 = vmatprep.subr.bf16.mxu1 %v2447_v2 }
 0x114   :  { %1112 = vmatpush1.bf16.msra.mxu0 %v2348_v5  ;;  %v358_v5 = vrot.slane %v89_v18, %v2797_v13 }
 0x115   :  { %1113 = vmatprep.subr.bf16.mxu0 %v2353_v7 }
 0x116   :  { %1407 = vmatpush1.bf16.msra.mxu1 %v2449_v16 }
 0x117   :  { %1830 = vmatprep.subr.bf16.mxu1 %v2452_v3 }
 0x118   :  { %1114 = vmatpush1.bf16.msra.mxu0 %v2351_v9 }
 0x119   :  { %1124 = vmatprep.subr.bf16.mxu0 %v2356_v12 }
 0x11b   :  { %1116 = vmatmul.mubr.bf16.vlgmr.msra.gmra.mrb[0].mxu0 %v218_v14 }
 0x11c   :  { %1125 = vmatpush1.bf16.msra.mxu0 %v2354_v15  ;;  %1156 = vmatprep.mubr.bf16.mxu0 %v221_v19 }
 0x11d   :  { %1126 = vmatprep.subr.bf16.mxu0 %v2359_v20 }
 0x120   :  { %1127 = vmatpush1.bf16.msra.mxu0 %v2357_v21 }
 0x121   :  { %1128 = vmatprep.subr.bf16.mxu0 %v2362_v22 }
 0x124   :  { %1129 = vmatpush1.bf16.msra.mxu0 %v2360_v23 }
 0x125   :  { %1130 = vmatprep.subr.bf16.mxu0 %v2365_v24  ;;  %v2450_v24 = vld [vmem:[#allocation10] ss:$16 sps:$4 sm:$0xff]  }
 0x128   :  { %1131 = vmatpush1.bf16.msra.mxu0 %v2363_v26 }
 0x129   :  { %1132 = vmatprep.subr.bf16.mxu0 %v2368_v27  ;;  %v2455_v27 = vld [vmem:[#allocation10 + $0x24] ss:$16 sps:$4 sm:$0xff]  }
 0x12c   :  { %1133 = vmatpush1.bf16.msra.mxu0 %v2366_v28  ;;  %v2453_v28 = vld [vmem:[#allocation10 + $0x20] ss:$16 sps:$4 sm:$0xff]  }
 0x12d   :  { %1134 = vmatprep.subr.bf16.mxu0 %v2371_v29  ;;  %v2458_v29 = vld [vmem:[#allocation10 + $0x44] ss:$16 sps:$4 sm:$0xff]  }
 0x130   :  { %1135 = vmatpush1.bf16.msra.mxu0 %v2369_v30  ;;  %v2456_v30 = vld [vmem:[#allocation10 + $0x40] ss:$16 sps:$4 sm:$0xff]  }
 0x131   :  { %1136 = vmatprep.subr.bf16.mxu0 %v2374_v31  ;;  %v2461_v31 = vld [vmem:[#allocation10 + $0x64] ss:$16 sps:$4 sm:$0xff]  }
 0x134   :  { %1137 = vmatpush1.bf16.msra.mxu0 %v2372_v32  ;;  %v2459_v32 = vld [vmem:[#allocation10 + $0x60] ss:$16 sps:$4 sm:$0xff]  }
 0x135   :  { %1138 = vmatprep.subr.bf16.mxu0 %v2377_v34  ;;  %v2464_v34 = vld [vmem:[#allocation10 + $0x84] ss:$16 sps:$4 sm:$0xff]  }
 0x138   :  { %1139 = vmatpush1.bf16.msra.mxu0 %v2375_v36  ;;  %v2462_v36 = vld [vmem:[#allocation10 + $0x80] ss:$16 sps:$4 sm:$0xff]  }
 0x139   :  { %1140 = vmatprep.subr.bf16.mxu0 %v2380_v37  ;;  %v2467_v37 = vld [vmem:[#allocation10 + $0xa4] ss:$16 sps:$4 sm:$0xff]  }
 0x13c   :  { %1141 = vmatpush1.bf16.msra.mxu0 %v2378_v38  ;;  %v2465_v38 = vld [vmem:[#allocation10 + $0xa0] ss:$16 sps:$4 sm:$0xff]  }
 0x13d   :  { %1142 = vmatprep.subr.bf16.mxu0 %v2383_v40  ;;  %v2470_v40 = vld [vmem:[#allocation10 + $0xc4] ss:$16 sps:$4 sm:$0xff]  }
 0x140   :  { %1143 = vmatpush1.bf16.msra.mxu0 %v2381_v42  ;;  %v2473_v42 = vld [vmem:[#allocation10 + $0xe4] ss:$16 sps:$4 sm:$0xff]  }
 0x141   :  { %1144 = vmatprep.subr.bf16.mxu0 %v2386_v43  ;;  %v2471_v43 = vld [vmem:[#allocation10 + $0xe0] ss:$16 sps:$4 sm:$0xff]  }
 0x144   :  { %1145 = vmatpush1.bf16.msra.mxu0 %v2384_v46  ;;  %v2479_v46 = vld [vmem:[#allocation10 + $0x124] ss:$16 sps:$4 sm:$0xff]  }
 0x145   :  { %1146 = vmatprep.subr.bf16.mxu0 %v2389_v47  ;;  %v2477_v47 = vld [vmem:[#allocation10 + $0x120] ss:$16 sps:$4 sm:$0xff]  }
 0x148   :  { %1147 = vmatpush1.bf16.msra.mxu0 %v2387_v51  ;;  %v2483_v51 = vld [vmem:[#allocation10 + $0x160] ss:$16 sps:$4 sm:$0xff]  }
 0x149   :  { %1148 = vmatprep.subr.bf16.mxu0 %v2392_v52  ;;  %v2488_v52 = vld [vmem:[#allocation10 + $0x184] ss:$16 sps:$4 sm:$0xff]  }
 0x14c   :  { %1149 = vmatpush1.bf16.msra.mxu0 %v2390_v10  ;;  %v2491_v10 = vld [vmem:[#allocation10 + $0x1a4] ss:$16 sps:$4 sm:$0xff]  }
 0x14d   :  { %1150 = vmatprep.subr.bf16.mxu0 %v2395_v54  ;;  %v2489_v54 = vld [vmem:[#allocation10 + $0x1a0] ss:$16 sps:$4 sm:$0xff]  }
 0x150   :  { %1151 = vmatpush1.bf16.msra.mxu0 %v2393_v56  ;;  %v2492_v56 = vld [vmem:[#allocation10 + $0x1c0] ss:$16 sps:$4 sm:$0xff]  }
 0x151   :  { %1152 = vmatprep.subr.bf16.mxu0 %v2398_v57  ;;  %v2497_v57 = vld [vmem:[#allocation10 + $0x1e4] ss:$16 sps:$4 sm:$0xff]  }
 0x154   :  { %1153 = vmatpush1.bf16.msra.mxu0 %v2396_v59  ;;  %v2500_v59 = vld [vmem:[#allocation10 + $0xc] ss:$16 sps:$4 sm:$0xff]  }
 0x155   :  { %1154 = vmatprep.subr.bf16.mxu0 %v2401_v39  ;;  %v90_v39 = vld [vmem:[#allocation5 + $0x12] sm:$0x3] }
 0x156   :  { %v1209_v17 = vrot.slane %v90_v39, %v2811_v33 }
 0x158   :  { %1155 = vmatpush1.bf16.msra.mxu0 %v2399_v60  ;;  %v1213_v60 = vrot.slane %v90_v39, %v2797_v13 }
 0x15b   :  { %1157 = vmatmul.mubr.bf16.vlgmr.msra.gmra.mrb[0].mxu0 %v220_v61 }
 0x22e   :  { %v1158_v6 = vpop.f32.mrb[0].mxu0 }
 0x22f   :  { %v2170_v7 = vadd.f32 %v1158_v6, %v354_v4  ;;  %v1160_v8 = vpop.f32.mrb[1].mxu0 }
 0x230   :  { %v2171_v9 = vadd.f32 %v1160_v8, %v358_v5  ;;  %v1162_v11 = vpop.f32.mrb[2].mxu0  ;;  %v2498_v8 = vld [vmem:[#allocation10 + $0x8] ss:$16 sps:$4 sm:$0xff]  }
 0x231   :  { %v2192_v12 = vround.rtne.f32 %v2170_v7  ;;  %v1163_v14 = vpop.f32.mrb[3].mxu0  ;;  %v2503_v11 = vld [vmem:[#allocation10 + $0x2c] ss:$16 sps:$4 sm:$0xff]  }
 0x232   :  { %v2193_v15 = vround.rtne.f32 %v2171_v9  ;;  %v2506_v14 = vld [vmem:[#allocation10 + $0x4c] ss:$16 sps:$4 sm:$0xff]  }
 0x233   :  { %v1167_v19 = vmax.f32 %v2192_v12, -2.0  ;;  %v2501_v12 = vld [vmem:[#allocation10 + $0x28] ss:$16 sps:$4 sm:$0xff]  }
 0x234   :  { %v1168_v20 = vmax.f32 %v2193_v15, -2.0  ;;  %v2504_v15 = vld [vmem:[#allocation10 + $0x48] ss:$16 sps:$4 sm:$0xff]  }
 0x235   :  { %v1169_v21 = vmin.f32 %v1167_v19, 1.0  ;;  %v2509_v19 = vld [vmem:[#allocation10 + $0x6c] ss:$16 sps:$4 sm:$0xff]  }
 0x236   :  { %v1170_v22 = vmin.f32 %v1168_v20, 1.0  ;;  %v2507_v20 = vld [vmem:[#allocation10 + $0x68] ss:$16 sps:$4 sm:$0xff]  }
 0x237   :  { %v1171_v26 = vpack.c.bf16 %v1169_v21, %v1169_v21  ;;  %v2512_v21 = vld [vmem:[#allocation10 + $0x8c] ss:$16 sps:$4 sm:$0xff]  }
 0x238   :  { %v1172_v23 = vpack.c.bf16 %v1170_v22, %v1170_v22  ;;  %v2510_v22 = vld [vmem:[#allocation10 + $0x88] ss:$16 sps:$4 sm:$0xff]  }
 0x23a   :  { %1408 = vmatprep.mubr.bf16.mxu1 %v1172_v23  ;;  %v2515_v23 = vld [vmem:[#allocation10 + $0xac] ss:$16 sps:$4 sm:$0xff]  }
 0x23b   :  { %1409 = vmatmul.mubr.bf16.vlgmr.msra.gmra.mrb[0].mxu1 %v1171_v26  ;;  %v2518_v26 = vld [vmem:[#allocation10 + $0xcc] ss:$16 sps:$4 sm:$0xff]  }
 0x23c   :  { %1831 = vmatpush1.bf16.msra.mxu1 %v2450_v24  ;;  %v2513_v24 = vld [vmem:[#allocation10 + $0xa8] ss:$16 sps:$4 sm:$0xff]  }
 0x23d   :  { %1832 = vmatprep.subr.bf16.mxu1 %v2455_v27  ;;  %v2516_v27 = vld [vmem:[#allocation10 + $0xc8] ss:$16 sps:$4 sm:$0xff]  }
 0x240   :  { %1833 = vmatpush1.bf16.msra.mxu1 %v2453_v28  ;;  %v2521_v28 = vld [vmem:[#allocation10 + $0xec] ss:$16 sps:$4 sm:$0xff]  }
 0x241   :  { %1834 = vmatprep.subr.bf16.mxu1 %v2458_v29  ;;  %v2519_v29 = vld [vmem:[#allocation10 + $0xe8] ss:$16 sps:$4 sm:$0xff]  }
 0x244   :  { %1835 = vmatpush1.bf16.msra.mxu1 %v2456_v30  ;;  %v2524_v30 = vld [vmem:[#allocation10 + $0x10c] ss:$16 sps:$4 sm:$0xff]  }
 0x245   :  { %1836 = vmatprep.subr.bf16.mxu1 %v2461_v31  ;;  %v2522_v31 = vld [vmem:[#allocation10 + $0x108] ss:$16 sps:$4 sm:$0xff]  }
 0x248   :  { %1837 = vmatpush1.bf16.msra.mxu1 %v2459_v32  ;;  %v2527_v32 = vld [vmem:[#allocation10 + $0x12c] ss:$16 sps:$4 sm:$0xff]  }
 0x249   :  { %1838 = vmatprep.subr.bf16.mxu1 %v2464_v34  ;;  %v2525_v34 = vld [vmem:[#allocation10 + $0x128] ss:$16 sps:$4 sm:$0xff]  }
 0x24c   :  { %1839 = vmatpush1.bf16.msra.mxu1 %v2462_v36  ;;  %v2530_v36 = vld [vmem:[#allocation10 + $0x14c] ss:$16 sps:$4 sm:$0xff]  }
 0x24d   :  { %1840 = vmatprep.subr.bf16.mxu1 %v2467_v37  ;;  %v2528_v37 = vld [vmem:[#allocation10 + $0x148] ss:$16 sps:$4 sm:$0xff]  }
 0x250   :  { %1841 = vmatpush1.bf16.msra.mxu1 %v2465_v38  ;;  %v2533_v38 = vld [vmem:[#allocation10 + $0x16c] ss:$16 sps:$4 sm:$0xff]  }
 0x251   :  { %1842 = vmatprep.subr.bf16.mxu1 %v2470_v40  ;;  %v2531_v40 = vld [vmem:[#allocation10 + $0x168] ss:$16 sps:$4 sm:$0xff]  }
 0x254   :  { %1843 = vmatpush1.bf16.msra.mxu1 %v2468_v41  ;;  %v2536_v41 = vld [vmem:[#allocation10 + $0x18c] ss:$16 sps:$4 sm:$0xff]  }
 0x255   :  { %1844 = vmatprep.subr.bf16.mxu1 %v2473_v42  ;;  %v2534_v42 = vld [vmem:[#allocation10 + $0x188] ss:$16 sps:$4 sm:$0xff]  }
 0x258   :  { %1845 = vmatpush1.bf16.msra.mxu1 %v2471_v43  ;;  %v2539_v43 = vld [vmem:[#allocation10 + $0x1ac] ss:$16 sps:$4 sm:$0xff]  }
 0x259   :  { %1846 = vmatprep.subr.bf16.mxu1 %v2476_v44  ;;  %v2537_v44 = vld [vmem:[#allocation10 + $0x1a8] ss:$16 sps:$4 sm:$0xff]  }
 0x25c   :  { %1847 = vmatpush1.bf16.msra.mxu1 %v2474_v45  ;;  %v2542_v45 = vld [vmem:[#allocation10 + $0x1cc] ss:$16 sps:$4 sm:$0xff]  }
 0x25d   :  { %1848 = vmatprep.subr.bf16.mxu1 %v2479_v46  ;;  %v2540_v46 = vld [vmem:[#allocation10 + $0x1c8] ss:$16 sps:$4 sm:$0xff]  }
 0x260   :  { %1849 = vmatpush1.bf16.msra.mxu1 %v2477_v47  ;;  %v2545_v47 = vld [vmem:[#allocation10 + $0x1ec] ss:$16 sps:$4 sm:$0xff]  }
 0x261   :  { %1850 = vmatprep.subr.bf16.mxu1 %v2482_v48  ;;  %v2543_v48 = vld [vmem:[#allocation10 + $0x1e8] ss:$16 sps:$4 sm:$0xff]  }
 0x264   :  { %1851 = vmatpush1.bf16.msra.mxu1 %v2480_v49  ;;  %v91_v49 = vld [vmem:[#allocation5 + $0x14] sm:$0xf] }
 0x265   :  { %1852 = vmatprep.subr.bf16.mxu1 %v2485_v50  ;;  %v1493_v50 = vrot.slane %v91_v49, %v2811_v33 }
 0x268   :  { %1853 = vmatpush1.bf16.msra.mxu1 %v2483_v51  ;;  %v1497_v51 = vrot.slane %v91_v49, %v2797_v13 }
 0x269   :  { %1854 = vmatprep.subr.bf16.mxu1 %v2488_v52 }
 0x26c   :  { %1855 = vmatpush1.bf16.msra.mxu1 %v2486_v53 }
 0x26d   :  { %1856 = vmatprep.subr.bf16.mxu1 %v2491_v10 }
 0x270   :  { %1857 = vmatpush1.bf16.msra.mxu1 %v2489_v54 }
 0x271   :  { %1858 = vmatprep.subr.bf16.mxu1 %v2494_v55 }
 0x274   :  { %1859 = vmatpush1.bf16.msra.mxu1 %v2492_v56 }
 0x275   :  { %1860 = vmatprep.subr.bf16.mxu1 %v2497_v57 }
 0x278   :  { %1861 = vmatpush1.bf16.msra.mxu1 %v2495_v58 }
 0x279   :  { %1871 = vmatprep.subr.bf16.mxu1 %v2500_v59 }
 0x30e   :  { %v1410_v61 = vpop.f32.mrb[0].mxu1 }
 0x30f   :  { %v1411_v62 = vadd.f32 %v1410_v61, %v1209_v17  ;;  %v1412_v63 = vpop.f32.mrb[1].mxu1 }
 0x310   :  { %v1413_v0 = vadd.f32 %v1412_v63, %v1213_v60  ;;  %v1414_v1 = vpop.f32.mrb[2].mxu1  ;;  %v1505_v63 = vrot.slane %v91_v49, %v2814_v35 }
 0x311   :  { %v2194_v2 = vround.rtne.f32 %v1411_v62  ;;  %v1415_v16 = vpop.f32.mrb[3].mxu1  ;;  %v1501_v62 = vrot.slane %v91_v49, %v2829_v25 }
 0x312   :  { %v2195_v3 = vround.rtne.f32 %v1413_v0 }
 0x313   :  { %v1419_v18 = vmax.f32 %v2194_v2, -2.0 }
 0x314   :  { %v1420_v4 = vmax.f32 %v2195_v3, -2.0 }
 0x315   :  { %v1421_v5 = vmin.f32 %v1419_v18, 1.0 }
 0x316   :  { %v1422_v6 = vmin.f32 %v1420_v4, 1.0 }
 0x317   :  { %v2854_v9 = vpack.c.bf16 %v1421_v5, %v1421_v5 }
 0x318   :  { %v1424_v7 = vpack.c.bf16 %v1422_v6, %v1422_v6 }
 0x31a   :  { %1862 = vmatprep.mubr.bf16.mxu1 %v1424_v7 }
 0x31b   :  { %1863 = vmatmul.mubr.bf16.vlgmr.msra.gmra.mrb[4].mxu1 %v2854_v9 }
 0x31c   :  { %1872 = vmatpush1.bf16.msra.mxu1 %v2498_v8  ;;  %1903 = vmatprep.mubr.bf16.mxu1 %v1424_v7 }
 0x31d   :  { %1873 = vmatprep.subr.bf16.mxu1 %v2503_v11 }
 0x320   :  { %1874 = vmatpush1.bf16.msra.mxu1 %v2501_v12 }
 0x321   :  { %1875 = vmatprep.subr.bf16.mxu1 %v2506_v14 }
 0x324   :  { %1876 = vmatpush1.bf16.msra.mxu1 %v2504_v15 }
 0x325   :  { %1877 = vmatprep.subr.bf16.mxu1 %v2509_v19 }
 0x328   :  { %1878 = vmatpush1.bf16.msra.mxu1 %v2507_v20 }
 0x329   :  { %1879 = vmatprep.subr.bf16.mxu1 %v2512_v21 }
 0x32c   :  { %1880 = vmatpush1.bf16.msra.mxu1 %v2510_v22 }
 0x32d   :  { %1881 = vmatprep.subr.bf16.mxu1 %v2515_v23 }
 0x330   :  { %1882 = vmatpush1.bf16.msra.mxu1 %v2513_v24 }
 0x331   :  { %1883 = vmatprep.subr.bf16.mxu1 %v2518_v26 }
 0x334   :  { %1884 = vmatpush1.bf16.msra.mxu1 %v2516_v27 }
 0x335   :  { %1885 = vmatprep.subr.bf16.mxu1 %v2521_v28 }
 0x338   :  { %1886 = vmatpush1.bf16.msra.mxu1 %v2519_v29 }
 0x339   :  { %1887 = vmatprep.subr.bf16.mxu1 %v2524_v30 }
 0x33c   :  { %1888 = vmatpush1.bf16.msra.mxu1 %v2522_v31 }
 0x33d   :  { %1889 = vmatprep.subr.bf16.mxu1 %v2527_v32 }
 0x340   :  { %1890 = vmatpush1.bf16.msra.mxu1 %v2525_v34 }
 0x341   :  { %1891 = vmatprep.subr.bf16.mxu1 %v2530_v36 }
 0x344   :  { %1892 = vmatpush1.bf16.msra.mxu1 %v2528_v37 }
 0x345   :  { %1893 = vmatprep.subr.bf16.mxu1 %v2533_v38 }
 0x348   :  { %1894 = vmatpush1.bf16.msra.mxu1 %v2531_v40 }
 0x349   :  { %1895 = vmatprep.subr.bf16.mxu1 %v2536_v41 }
 0x34c   :  { %1896 = vmatpush1.bf16.msra.mxu1 %v2534_v42 }
 0x34d   :  { %1897 = vmatprep.subr.bf16.mxu1 %v2539_v43 }
 0x350   :  { %1898 = vmatpush1.bf16.msra.mxu1 %v2537_v44 }
 0x351   :  { %1899 = vmatprep.subr.bf16.mxu1 %v2542_v45 }
 0x354   :  { %1900 = vmatpush1.bf16.msra.mxu1 %v2540_v46 }
 0x355   :  { %1901 = vmatprep.subr.bf16.mxu1 %v2545_v47 }
 0x358   :  { %1902 = vmatpush1.bf16.msra.mxu1 %v2543_v48 }
 0x35b   :  { %1904 = vmatmul.mubr.bf16.vlgmr.msra.gmra.mrb[8].mxu1 %v2854_v9 }
 0x3ee   :  { %v1864_v52 = vpop.f32.mrb[4].mxu1 }
 0x3ef   :  { %v1865_v53 = vadd.f32 %v1864_v52, %v1493_v50  ;;  %v1866_v10 = vpop.f32.mrb[5].mxu1 }
 0x3f0   :  { %v1867_v54 = vadd.f32 %v1866_v10, %v1497_v51  ;;  %v1868_v55 = vpop.f32.mrb[6].mxu1 }
 0x3f1   :  { %v2196_v56 = vround.rtne.f32 %v1865_v53  ;;  %v1869_v57 = vpop.f32.mrb[7].mxu1 }
 0x3f2   :  { %v2197_v58 = vround.rtne.f32 %v1867_v54 }
 0x3f3   :  { %v1916_v59 = vmax.f32 %v2196_v56, -2.0 }
 0x3f4   :  { %v1917_v39 = vmax.f32 %v2197_v58, -2.0 }
 0x3f5   :  { %v1920_v17 = vmin.f32 %v1916_v59, 1.0 }
 0x3f6   :  { %v1921_v60 = vmin.f32 %v1917_v39, 1.0 }
 0x3f8   :  { %v1924_v61 = vadd.f32 %v1921_v60, %v1920_v17 }
 0x42e   :  { %v1905_v33 = vpop.f32.mrb[8].mxu1 }
 0x42f   :  { %v1906_v0 = vadd.f32 %v1905_v33, %v1501_v62  ;;  %v1907_v13 = vpop.f32.mrb[9].mxu1 }
 0x430   :  { %v1908_v1 = vadd.f32 %v1907_v13, %v1505_v63  ;;  %v1909_v2 = vpop.f32.mrb[10].mxu1 }
 0x431   :  { %v2198_v16 = vround.rtne.f32 %v1906_v0  ;;  %v1910_v3 = vpop.f32.mrb[11].mxu1 }
 0x432   :  { %v2199_v18 = vround.rtne.f32 %v1908_v1 }
 0x433   :  { %v1918_v4 = vmax.f32 %v2198_v16, -2.0 }
 0x434   :  { %v1919_v5 = vmax.f32 %v2199_v18, -2.0 }
 0x435   :  { %v1922_v6 = vmin.f32 %v1918_v4, 1.0 }
 0x436   :  { %v1923_v7 = vmin.f32 %v1919_v5, 1.0 }
 0x437   :  { %v1925_v8 = vadd.f32 %v1924_v61, %v1922_v6 }
 0x439   :  { %v1926_v9 = vadd.f32 %v1925_v8, %v1923_v7 }
 0x43b   :  { %v1927_v11 = vmul.f32 0.16625, %v1926_v9 }
 0x43d   :  { %1928 = vst [vmem:[#allocation11] sm:$0xff] %v1927_v11 }
 0x43e   :  { %2669 = shalt.err (!%p2666_p2)
}
 0x43f   :  { %s2670_s30 = scalar_lea.hbm %s2879_s5, 128 }
 0x440   :  { %p2671_p3 = scmp.ne.s32.totalorder %s2879_s5, %s2670_s30  ;;  %p2674_p4 = scmp.lt.u32.totalorder %s2670_s30, %s2879_s5 }
 0x442   :  { %p2676_p5 = pnand %p2674_p4, %p2671_p3 }
 0x444   :  { %2679 = shalt.err (!%p2676_p5)
}
 0x445   :  { %1938 = dma.vmem_to_hbm [thread:$0]  %s1936_s27, 128, %s2879_s5, [#allocation4]  }
 0x446   :  { %2686 = dma.done.wait [#allocation4], 128  }
 0x447   :  { %2687 = vsyncadd [#allocation4], 4294967168 }
 0x448   :  { %1942 = vsyncpa [#allocation3], 1 }
 0x449   :  { %1943 = vsyncpa [#allocation6], 1 }
 0x44a   :  { %1944 = vsyncpa [#allocation9], 1 }
 0x44b   :  { %1945 = vsyncpa [#allocation4], 1 }

</bundles_post_ra>
